<compile_context>
chip_gen: v7x
topology: tpu7x:2x2x1
jax: 0.10.0
libtpu: 0.0.40
codegen_flags: <defaults>
</compile_context>

<pallas_src>
import functools
import math

import jax
import jax.numpy as jnp
import numpy as np
from jax import lax
from jax.experimental import pallas as pl
from jax.experimental.pallas import tpu as pltpu


def _round_up(x, m):
    return (x + m - 1) // m * m


def make_lstm_kernel(n_layers: int, T: int, Bc: int, Hp: int):
    """Kernel over one batch chunk: all layers, all timesteps, plus FC head."""

    def kernel(*refs):
        # inputs : x_ref, h0_ref, c0_ref, [wih, whh, b] * L, fcw, fcb
        # outputs: out_ref, hN_ref, cN_ref
        # scratch: seq_sc (T*Bc, Hp)  inter-layer sequence buffer
        #          proj_sc (T*Bc, 4Hp) hoisted input-projection buffer
        x_ref, h0_ref, c0_ref = refs[0], refs[1], refs[2]
        wrefs = refs[3:3 + 3 * n_layers]
        fcw_ref = refs[3 + 3 * n_layers]
        fcb_ref = refs[4 + 3 * n_layers]
        out_ref = refs[5 + 3 * n_layers]
        hN_ref = refs[6 + 3 * n_layers]
        cN_ref = refs[7 + 3 * n_layers]
        seq_sc = refs[8 + 3 * n_layers]
        proj_sc = refs[9 + 3 * n_layers]

        x_flat = x_ref[0]  # (T*Bc, Dp) — time-major, batch within each timestep

        # TODO(synk): nn.LSTM inter-layer dropout (drop_prob) is a no-op in eval
        # mode and is intentionally omitted (inference semantics).
        h_last = None
        for l in range(n_layers):
            wih = wrefs[3 * l][...]      # (in_p, 4Hp)  pre-transposed, gate-padded
            whh = wrefs[3 * l + 1][...]  # (Hp,   4Hp)
            b = wrefs[3 * l + 2][...]    # (1,    4Hp)  = b_ih + b_hh, padded

            layer_in = x_flat if l == 0 else seq_sc[...]
            # Hoisted input projection: one big GEMM over all T timesteps
            # (M = T*Bc rows feeds the MXU far better than T tiny matmuls).
            proj_sc[...] = (jnp.dot(layer_in, wih,
                                    preferred_element_type=jnp.float32) + b)

            def step(t, carry):
                h_prev, c_prev = carry
                row = pl.multiple_of(t * Bc, 8)
                # Only the recurrent matmul stays on the serial path; the bias
                # is already folded into proj_sc.
                g = (proj_sc[pl.ds(row, Bc), :]
                     + jnp.dot(h_prev, whh, preferred_element_type=jnp.float32))
                # PyTorch gate order: input, forget, cell(g), output.
                # Each slice is a lane-aligned multiple of 128.
                i_g = jax.nn.sigmoid(g[:, 0 * Hp:1 * Hp])
                f_g = jax.nn.sigmoid(g[:, 1 * Hp:2 * Hp])
                g_g = jnp.tanh(g[:, 2 * Hp:3 * Hp])
                o_g = jax.nn.sigmoid(g[:, 3 * Hp:4 * Hp])
                c_new = f_g * c_prev + i_g * g_g
                h_new = o_g * jnp.tanh(c_new)
                seq_sc[pl.ds(row, Bc), :] = h_new  # feeds the next layer
                return (h_new, c_new)

            h_fin, c_fin = lax.fori_loop(0, T, step, (h0_ref[l], c0_ref[l]))
            hN_ref[l] = h_fin
            cN_ref[l] = c_fin
            h_last = h_fin

        # FC head: ReLU(h_T of top layer) @ fc_w + fc_b  (lane-dense, padded O).
        hid = jnp.maximum(h_last, 0.0)
        out_ref[...] = (jnp.dot(hid, fcw_ref[...],
                                preferred_element_type=jnp.float32)
                        + fcb_ref[...])

    return kernel


def pack_params(params, input_dim, hidden_dim, output_dim, n_layers):
    """One-time weight packing: transpose, pre-sum biases, pad each gate block
    to a lane-aligned (multiple-of-128) width and inputs to tile-aligned rows.
    Zero padding is semantically inert (padded hidden units stay exactly 0)."""
    H = hidden_dim
    Hp = _round_up(H, 128)
    Dp = _round_up(input_dim, 128)
    Op = _round_up(output_dim, 128)
    packed = {}
    for l in range(n_layers):
        in_l = input_dim if l == 0 else H
        in_p = Dp if l == 0 else Hp
        wih = params[f"w_ih_{l}"].T.reshape(in_l, 4, H)     # (in, gate, H)
        whh = params[f"w_hh_{l}"].T.reshape(H, 4, H)
        b = (params[f"b_ih_{l}"] + params[f"b_hh_{l}"]).reshape(4, H)
        wih = jnp.pad(wih, ((0, in_p - in_l), (0, 0), (0, Hp - H)))
        whh = jnp.pad(whh, ((0, Hp - H), (0, 0), (0, Hp - H)))
        b = jnp.pad(b, ((0, 0), (0, Hp - H)))
        packed[f"wih_{l}"] = wih.reshape(in_p, 4 * Hp)
        packed[f"whh_{l}"] = whh.reshape(Hp, 4 * Hp)
        packed[f"b_{l}"] = b.reshape(1, 4 * Hp)
    packed["fc_w"] = jnp.pad(params["fc_w"].T,
                             ((0, Hp - H), (0, Op - output_dim)))
    packed["fc_b"] = jnp.pad(params["fc_b"],
                             (0, Op - output_dim)).reshape(1, Op)
    return packed


def lstm_net_forward(x, h0, c0, packed, n_layers, hidden_dim, output_dim,
                     batch_block=None):
    """Pallas forward of LSTMNet: returns (out, (h_n, c_n))."""
    B, T, D = x.shape
    L, H, O = n_layers, hidden_dim, output_dim
    Hp = _round_up(H, 128)
    Dp = _round_up(D, 128)
    Op = _round_up(O, 128)
    Bp = _round_up(B, 8)
    Bc = Bp if batch_block is None else batch_block
    assert Bc % 8 == 0 and Bp % Bc == 0
    nb = Bp // Bc  # batch chunks -> "parallel" grid axis (2nd TC on v7x)

    # Per-call data padding (cheap); weights were packed once outside.
    x_tbd = jnp.transpose(x, (1, 0, 2))                                 # (T,B,D)
    x_p = jnp.pad(x_tbd, ((0, 0), (0, Bp - B), (0, Dp - D)))            # (T,Bp,Dp)
    x_p = (x_p.reshape(T, nb, Bc, Dp).transpose(1, 0, 2, 3)
           .reshape(nb, T * Bc, Dp))                                    # per-chunk slab
    h0_p = jnp.pad(h0, ((0, 0), (0, Bp - B), (0, Hp - H)))
    c0_p = jnp.pad(c0, ((0, 0), (0, Bp - B), (0, Hp - H)))

    args = [x_p, h0_p, c0_p]
    in_specs = [
        pl.BlockSpec((1, T * Bc, Dp), lambda bi: (bi, 0, 0)),
        pl.BlockSpec((L, Bc, Hp), lambda bi: (0, bi, 0)),
        pl.BlockSpec((L, Bc, Hp), lambda bi: (0, bi, 0)),
    ]
    for l in range(L):
        for name in (f"wih_{l}", f"whh_{l}", f"b_{l}"):
            w = packed[name]
            args.append(w)
            in_specs.append(pl.BlockSpec(w.shape, lambda bi: (0, 0)))
    args += [packed["fc_w"], packed["fc_b"]]
    in_specs += [pl.BlockSpec(packed["fc_w"].shape, lambda bi: (0, 0)),
                 pl.BlockSpec(packed["fc_b"].shape, lambda bi: (0, 0))]

    out_shape = (
        jax.ShapeDtypeStruct((Bp, Op), jnp.float32),
        jax.ShapeDtypeStruct((L, Bp, Hp), jnp.float32),
        jax.ShapeDtypeStruct((L, Bp, Hp), jnp.float32),
    )
    out_specs = [
        pl.BlockSpec((Bc, Op), lambda bi: (bi, 0)),
        pl.BlockSpec((L, Bc, Hp), lambda bi: (0, bi, 0)),
        pl.BlockSpec((L, Bc, Hp), lambda bi: (0, bi, 0)),
    ]

    out_p, hN_p, cN_p = pl.pallas_call(
        make_lstm_kernel(L, T, Bc, Hp),
        out_shape=out_shape,
        grid_spec=pltpu.PrefetchScalarGridSpec(
            num_scalar_prefetch=0,
            grid=(nb,),
            in_specs=in_specs,
            out_specs=out_specs,
            scratch_shapes=[
                pltpu.VMEM((T * Bc, Hp), jnp.float32),       # inter-layer seq
                pltpu.VMEM((T * Bc, 4 * Hp), jnp.float32),   # hoisted projection
            ],
        ),
        # Batch chunks are independent -> "parallel" (uses both TCs on v7x).
        # NOTE: for large H on v7x (64 MiB VMEM), also single-buffer the
        # constant weight blocks and set vmem_limit_bytes explicitly.
        compiler_params=pltpu.CompilerParams(
            dimension_semantics=("parallel",)),
    )(*args)

    # Un-pad (lane-dense outputs in the kernel; slicing is wrapper plumbing).
    out = out_p[:B, :O]
    h_n = hN_p[:, :B, :H]
    c_n = cN_p[:, :B, :H]
    return out, (h_n, c_n)


# ---------------- pure-JAX reference (for correctness check) ----------------
def lstm_net_reference(x, h0, c0, params, n_layers, hidden_dim, output_dim):
    B, T, D = x.shape
    H = hidden_dim
    h = [h0[l] for l in range(n_layers)]
    c = [c0[l] for l in range(n_layers)]
    layer_in = x
    for l in range(n_layers):
        wih, whh = params[f"w_ih_{l}"], params[f"w_hh_{l}"]
        b = params[f"b_ih_{l}"] + params[f"b_hh_{l}"]
        outs = []
        ht, ct = h[l], c[l]
        for t in range(T):
            gates = layer_in[:, t] @ wih.T + ht @ whh.T + b
            i_g = jax.nn.sigmoid(gates[:, 0 * H:1 * H])
            f_g = jax.nn.sigmoid(gates[:, 1 * H:2 * H])
            g_g = jnp.tanh(gates[:, 2 * H:3 * H])
            o_g = jax.nn.sigmoid(gates[:, 3 * H:4 * H])
            ct = f_g * ct + i_g * g_g
            ht = o_g * jnp.tanh(ct)
            outs.append(ht)
        h[l], c[l] = ht, ct
        layer_in = jnp.stack(outs, axis=1)
    out = jnp.maximum(layer_in[:, -1], 0.0) @ params["fc_w"].T + params["fc_b"]
    return out, (jnp.stack(h), jnp.stack(c))


def init_params(key, input_dim, hidden_dim, output_dim, n_layers):
    """Deterministic init mirroring PyTorch's uniform(-1/sqrt(H), 1/sqrt(H))."""
    params = {}
    k = 1.0 / math.sqrt(hidden_dim)
    for l in range(n_layers):
        in_l = input_dim if l == 0 else hidden_dim
        key, k1, k2, k3, k4 = jax.random.split(key, 5)
        params[f"w_ih_{l}"] = jax.random.uniform(k1, (4 * hidden_dim, in_l),
                                                 jnp.float32, -k, k)
        params[f"w_hh_{l}"] = jax.random.uniform(k2, (4 * hidden_dim, hidden_dim),
                                                 jnp.float32, -k, k)
        params[f"b_ih_{l}"] = jax.random.uniform(k3, (4 * hidden_dim,),
                                                 jnp.float32, -k, k)
        params[f"b_hh_{l}"] = jax.random.uniform(k4, (4 * hidden_dim,),
                                                 jnp.float32, -k, k)
    key, k1, k2 = jax.random.split(key, 3)
    params["fc_w"] = jax.random.uniform(k1, (output_dim, hidden_dim),
                                        jnp.float32, -k, k)
    params["fc_b"] = jax.random.uniform(k2, (output_dim,), jnp.float32, -k, k)
    return params


if __name__ == "__main__":
    B, T = 2, 8
    input_dim, hidden_dim, output_dim, n_layers = 16, 32, 4, 2

    key = jax.random.PRNGKey(0)
    key, kx = jax.random.split(key)
    x = jax.random.normal(kx, (B, T, input_dim), jnp.float32)
    params = init_params(key, input_dim, hidden_dim, output_dim, n_layers)

    # init_hidden(batch_size) semantics: zeros of shape (n_layers, B, H)
    h0 = jnp.zeros((n_layers, B, hidden_dim), jnp.float32)
    c0 = jnp.zeros((n_layers, B, hidden_dim), jnp.float32)

    # Weights are packed (transposed / padded / bias-summed) exactly once.
    packed = jax.tree_util.tree_map(
        jax.block_until_ready,
        pack_params(params, input_dim, hidden_dim, output_dim, n_layers))

    fwd = jax.jit(functools.partial(lstm_net_forward,
                                    n_layers=n_layers,
                                    hidden_dim=hidden_dim,
                                    output_dim=output_dim))
    out, (h_n, c_n) = fwd(x, h0, c0, packed)
    jax.block_until_ready((out, h_n, c_n))

    ref_out, (ref_h, ref_c) = lstm_net_reference(
        x, h0, c0, params, n_layers, hidden_dim, output_dim)

    np.testing.assert_allclose(np.asarray(out), np.asarray(ref_out),
                               rtol=1e-5, atol=1e-5)
    np.testing.assert_allclose(np.asarray(h_n), np.asarray(ref_h),
                               rtol=1e-5, atol=1e-5)
    np.testing.assert_allclose(np.asarray(c_n), np.asarray(ref_c),
                               rtol=1e-5, atol=1e-5)
    print("KERNEL_OK")
</pallas_src>

<mosaic_0001>
module attributes {stable_mosaic.version = 11 : i64} {
  func.func @kernel(%arg0: i32, %arg1: memref<1x64x128xf32, #tpu.memory_space<vmem>>, %arg2: memref<2x8x128xf32, #tpu.memory_space<vmem>>, %arg3: memref<2x8x128xf32, #tpu.memory_space<vmem>>, %arg4: memref<128x512xf32, #tpu.memory_space<vmem>>, %arg5: memref<128x512xf32, #tpu.memory_space<vmem>>, %arg6: memref<1x512xf32, #tpu.memory_space<vmem>>, %arg7: memref<128x512xf32, #tpu.memory_space<vmem>>, %arg8: memref<128x512xf32, #tpu.memory_space<vmem>>, %arg9: memref<1x512xf32, #tpu.memory_space<vmem>>, %arg10: memref<128x128xf32, #tpu.memory_space<vmem>>, %arg11: memref<1x128xf32, #tpu.memory_space<vmem>>, %arg12: memref<8x128xf32, #tpu.memory_space<vmem>>, %arg13: memref<2x8x128xf32, #tpu.memory_space<vmem>>, %arg14: memref<2x8x128xf32, #tpu.memory_space<vmem>>, %arg15: memref<64x128xf32, #tpu.memory_space<vmem>>, %arg16: memref<64x512xf32, #tpu.memory_space<vmem>>) attributes {dimension_semantics = [#tpu.dimension_semantics<parallel>], iteration_bounds = array<i64: 1>, scalar_prefetch = 0 : i64, scratch_operands = 2 : i64, tpu.core_type = #tpu.core_type<tc>, window_params = [{transform_indices = @transform_0, window_bounds = array<i64: 1, 64, 128>}, {transform_indices = @transform_1, window_bounds = array<i64: 2, 8, 128>}, {transform_indices = @transform_2, window_bounds = array<i64: 2, 8, 128>}, {pipeline_mode = #tpu.pipeline_mode<synchronous>, transform_indices = @transform_3, window_bounds = array<i64: 128, 512>}, {pipeline_mode = #tpu.pipeline_mode<synchronous>, transform_indices = @transform_4, window_bounds = array<i64: 128, 512>}, {pipeline_mode = #tpu.pipeline_mode<synchronous>, transform_indices = @transform_5, window_bounds = array<i64: 1, 512>}, {pipeline_mode = #tpu.pipeline_mode<synchronous>, transform_indices = @transform_6, window_bounds = array<i64: 128, 512>}, {pipeline_mode = #tpu.pipeline_mode<synchronous>, transform_indices = @transform_7, window_bounds = array<i64: 128, 512>}, {pipeline_mode = #tpu.pipeline_mode<synchronous>, transform_indices = @transform_8, window_bounds = array<i64: 1, 512>}, {pipeline_mode = #tpu.pipeline_mode<synchronous>, transform_indices = @transform_9, window_bounds = array<i64: 128, 128>}, {pipeline_mode = #tpu.pipeline_mode<synchronous>, transform_indices = @transform_10, window_bounds = array<i64: 1, 128>}, {transform_indices = @transform_11, window_bounds = array<i64: 8, 128>}, {transform_indices = @transform_12, window_bounds = array<i64: 2, 8, 128>}, {transform_indices = @transform_13, window_bounds = array<i64: 2, 8, 128>}]} {
    %c0 = arith.constant 0 : index
    %c0_0 = arith.constant 0 : index
    %c0_1 = arith.constant 0 : index
    %0 = vector.load %arg1[%c0, %c0_0, %c0_1] : memref<1x64x128xf32, #tpu.memory_space<vmem>>, vector<1x64x128xf32>
    %1 = vector.shape_cast %0 : vector<1x64x128xf32> to vector<64x128xf32>
    %c0_2 = arith.constant 0 : index
    %c0_3 = arith.constant 0 : index
    %2 = vector.load %arg4[%c0_2, %c0_3] : memref<128x512xf32, #tpu.memory_space<vmem>>, vector<128x512xf32>
    %c0_4 = arith.constant 0 : index
    %c0_5 = arith.constant 0 : index
    %3 = vector.load %arg5[%c0_4, %c0_5] : memref<128x512xf32, #tpu.memory_space<vmem>>, vector<128x512xf32>
    %c0_6 = arith.constant 0 : index
    %c0_7 = arith.constant 0 : index
    %4 = vector.load %arg6[%c0_6, %c0_7] : memref<1x512xf32, #tpu.memory_space<vmem>>, vector<1x512xf32>
    %cst = arith.constant dense<0.000000e+00> : vector<64x512xf32>
    %5 = tpu.matmul %1, %2, %cst {dimension_numbers = #tpu.dot_dimension_numbers<[1], [0], [0], [1], [0, 0, 1, 1], [], []>} : vector<64x128xf32>, vector<128x512xf32>, vector<64x512xf32> -> vector<64x512xf32>
    %6 = vector.broadcast %4 : vector<1x512xf32> to vector<64x512xf32>
    %7 = arith.addf %5, %6 : vector<64x512xf32>
    %c0_8 = arith.constant 0 : index
    %c0_9 = arith.constant 0 : index
    %8 = vector.load %arg16[%c0_8, %c0_9] : memref<64x512xf32, #tpu.memory_space<vmem>>, vector<64x512xf32>
    tpu.vector_store %arg16[%c0_8, %c0_9], %7 {strides = array<i32>} : memref<64x512xf32, #tpu.memory_space<vmem>>, vector<64x512xf32>,
    %c0_10 = arith.constant 0 : index
    %c0_11 = arith.constant 0 : index
    %c0_12 = arith.constant 0 : index
    %9 = vector.load %arg2[%c0_10, %c0_11, %c0_12] : memref<2x8x128xf32, #tpu.memory_space<vmem>>, vector<1x8x128xf32>
    %10 = vector.shape_cast %9 : vector<1x8x128xf32> to vector<8x128xf32>
    %c0_13 = arith.constant 0 : index
    %c0_14 = arith.constant 0 : index
    %c0_15 = arith.constant 0 : index
    %11 = vector.load %arg3[%c0_13, %c0_14, %c0_15] : memref<2x8x128xf32, #tpu.memory_space<vmem>>, vector<1x8x128xf32>
    %12 = vector.shape_cast %11 : vector<1x8x128xf32> to vector<8x128xf32>
    %c0_i32 = arith.constant 0 : i32
    %c8_i32 = arith.constant 8 : i32
    %13 = arith.addi %c0_i32, %c8_i32 : i32
    %c1_i32 = arith.constant 1 : i32
    %14:2 = scf.for %arg17 = %c0_i32 to %13 step %c1_i32 iter_args(%arg18 = %10, %arg19 = %12) -> (vector<8x128xf32>, vector<8x128xf32>)  : i32 {
      %c8_i32_57 = arith.constant 8 : i32
      %49 = arith.muli %arg17, %c8_i32_57 : i32
      %50 = tpu.assume_multiple %49, 8 : i32
      %51 = arith.index_cast %50 : i32 to index
      %c0_58 = arith.constant 0 : index
      %52 = vector.load %arg16[%51, %c0_58] : memref<64x512xf32, #tpu.memory_space<vmem>>, vector<8x512xf32>
      %cst_59 = arith.constant dense<0.000000e+00> : vector<8x512xf32>
      %53 = tpu.matmul %arg18, %3, %cst_59 {dimension_numbers = #tpu.dot_dimension_numbers<[1], [0], [0], [1], [0, 0, 1, 1], [], []>} : vector<8x128xf32>, vector<128x512xf32>, vector<8x512xf32> -> vector<8x512xf32>
      %54 = arith.addf %52, %53 : vector<8x512xf32>
      %55 = vector.extract_strided_slice %54 {offsets = [0, 0], sizes = [8, 128], strides = [1, 1]} : vector<8x512xf32> to vector<8x128xf32>
      %56 = arith.negf %55 : vector<8x128xf32>
      %57 = math.exp %56 : vector<8x128xf32>
      %cst_60 = arith.constant 1.000000e+00 : f32
      %58 = vector.broadcast %cst_60 : f32 to vector<8x128xf32>
      %59 = arith.addf %58, %57 : vector<8x128xf32>
      %60 = arith.divf %58, %59 : vector<8x128xf32>
      %61 = vector.extract_strided_slice %54 {offsets = [0, 128], sizes = [8, 128], strides = [1, 1]} : vector<8x512xf32> to vector<8x128xf32>
      %62 = arith.negf %61 : vector<8x128xf32>
      %63 = math.exp %62 : vector<8x128xf32>
      %cst_61 = arith.constant 1.000000e+00 : f32
      %64 = vector.broadcast %cst_61 : f32 to vector<8x128xf32>
      %65 = arith.addf %64, %63 : vector<8x128xf32>
      %66 = arith.divf %64, %65 : vector<8x128xf32>
      %67 = vector.extract_strided_slice %54 {offsets = [0, 256], sizes = [8, 128], strides = [1, 1]} : vector<8x512xf32> to vector<8x128xf32>
      %68 = math.tanh %67 : vector<8x128xf32>
      %69 = vector.extract_strided_slice %54 {offsets = [0, 384], sizes = [8, 128], strides = [1, 1]} : vector<8x512xf32> to vector<8x128xf32>
      %70 = arith.negf %69 : vector<8x128xf32>
      %71 = math.exp %70 : vector<8x128xf32>
      %cst_62 = arith.constant 1.000000e+00 : f32
      %72 = vector.broadcast %cst_62 : f32 to vector<8x128xf32>
      %73 = arith.addf %72, %71 : vector<8x128xf32>
      %74 = arith.divf %72, %73 : vector<8x128xf32>
      %75 = arith.mulf %66, %arg19 : vector<8x128xf32>
      %76 = arith.mulf %60, %68 : vector<8x128xf32>
      %77 = arith.addf %75, %76 : vector<8x128xf32>
      %78 = math.tanh %77 : vector<8x128xf32>
      %79 = arith.mulf %74, %78 : vector<8x128xf32>
      %80 = arith.index_cast %50 : i32 to index
      %c0_63 = arith.constant 0 : index
      %81 = vector.load %arg15[%80, %c0_63] : memref<64x128xf32, #tpu.memory_space<vmem>>, vector<8x128xf32>
      tpu.vector_store %arg15[%80, %c0_63], %79 {strides = array<i32>} : memref<64x128xf32, #tpu.memory_space<vmem>>, vector<8x128xf32>,
      scf.yield %79, %77 : vector<8x128xf32>, vector<8x128xf32>
    }
    %c8_i32_16 = arith.constant 8 : i32
    %c0_17 = arith.constant 0 : index
    %c0_18 = arith.constant 0 : index
    %c0_19 = arith.constant 0 : index
    %15 = vector.load %arg13[%c0_17, %c0_18, %c0_19] : memref<2x8x128xf32, #tpu.memory_space<vmem>>, vector<1x8x128xf32>
    %16 = vector.shape_cast %15 : vector<1x8x128xf32> to vector<8x128xf32>
    %17 = vector.shape_cast %14#0 : vector<8x128xf32> to vector<1x8x128xf32>
    tpu.vector_store %arg13[%c0_17, %c0_18, %c0_19], %17 {strides = array<i32>} : memref<2x8x128xf32, #tpu.memory_space<vmem>>, vector<1x8x128xf32>,
    %c0_20 = arith.constant 0 : index
    %c0_21 = arith.constant 0 : index
    %c0_22 = arith.constant 0 : index
    %18 = vector.load %arg14[%c0_20, %c0_21, %c0_22] : memref<2x8x128xf32, #tpu.memory_space<vmem>>, vector<1x8x128xf32>
    %19 = vector.shape_cast %18 : vector<1x8x128xf32> to vector<8x128xf32>
    %20 = vector.shape_cast %14#1 : vector<8x128xf32> to vector<1x8x128xf32>
    tpu.vector_store %arg14[%c0_20, %c0_21, %c0_22], %20 {strides = array<i32>} : memref<2x8x128xf32, #tpu.memory_space<vmem>>, vector<1x8x128xf32>,
    %c0_23 = arith.constant 0 : index
    %c0_24 = arith.constant 0 : index
    %21 = vector.load %arg7[%c0_23, %c0_24] : memref<128x512xf32, #tpu.memory_space<vmem>>, vector<128x512xf32>
    %c0_25 = arith.constant 0 : index
    %c0_26 = arith.constant 0 : index
    %22 = vector.load %arg8[%c0_25, %c0_26] : memref<128x512xf32, #tpu.memory_space<vmem>>, vector<128x512xf32>
    %c0_27 = arith.constant 0 : index
    %c0_28 = arith.constant 0 : index
    %23 = vector.load %arg9[%c0_27, %c0_28] : memref<1x512xf32, #tpu.memory_space<vmem>>, vector<1x512xf32>
    %c0_29 = arith.constant 0 : index
    %c0_30 = arith.constant 0 : index
    %24 = vector.load %arg15[%c0_29, %c0_30] : memref<64x128xf32, #tpu.memory_space<vmem>>, vector<64x128xf32>
    %cst_31 = arith.constant dense<0.000000e+00> : vector<64x512xf32>
    %25 = tpu.matmul %24, %21, %cst_31 {dimension_numbers = #tpu.dot_dimension_numbers<[1], [0], [0], [1], [0, 0, 1, 1], [], []>} : vector<64x128xf32>, vector<128x512xf32>, vector<64x512xf32> -> vector<64x512xf32>
    %26 = vector.broadcast %23 : vector<1x512xf32> to vector<64x512xf32>
    %27 = arith.addf %25, %26 : vector<64x512xf32>
    %c0_32 = arith.constant 0 : index
    %c0_33 = arith.constant 0 : index
    %28 = vector.load %arg16[%c0_32, %c0_33] : memref<64x512xf32, #tpu.memory_space<vmem>>, vector<64x512xf32>
    tpu.vector_store %arg16[%c0_32, %c0_33], %27 {strides = array<i32>} : memref<64x512xf32, #tpu.memory_space<vmem>>, vector<64x512xf32>,
    %c1 = arith.constant 1 : index
    %c0_34 = arith.constant 0 : index
    %c0_35 = arith.constant 0 : index
    %29 = vector.load %arg2[%c1, %c0_34, %c0_35] : memref<2x8x128xf32, #tpu.memory_space<vmem>>, vector<1x8x128xf32>
    %30 = vector.shape_cast %29 : vector<1x8x128xf32> to vector<8x128xf32>
    %c1_36 = arith.constant 1 : index
    %c0_37 = arith.constant 0 : index
    %c0_38 = arith.constant 0 : index
    %31 = vector.load %arg3[%c1_36, %c0_37, %c0_38] : memref<2x8x128xf32, #tpu.memory_space<vmem>>, vector<1x8x128xf32>
    %32 = vector.shape_cast %31 : vector<1x8x128xf32> to vector<8x128xf32>
    %c0_i32_39 = arith.constant 0 : i32
    %c8_i32_40 = arith.constant 8 : i32
    %33 = arith.addi %c0_i32_39, %c8_i32_40 : i32
    %c1_i32_41 = arith.constant 1 : i32
    %34:2 = scf.for %arg17 = %c0_i32_39 to %33 step %c1_i32_41 iter_args(%arg18 = %30, %arg19 = %32) -> (vector<8x128xf32>, vector<8x128xf32>)  : i32 {
      %c8_i32_57 = arith.constant 8 : i32
      %49 = arith.muli %arg17, %c8_i32_57 : i32
      %50 = tpu.assume_multiple %49, 8 : i32
      %51 = arith.index_cast %50 : i32 to index
      %c0_58 = arith.constant 0 : index
      %52 = vector.load %arg16[%51, %c0_58] : memref<64x512xf32, #tpu.memory_space<vmem>>, vector<8x512xf32>
      %cst_59 = arith.constant dense<0.000000e+00> : vector<8x512xf32>
      %53 = tpu.matmul %arg18, %22, %cst_59 {dimension_numbers = #tpu.dot_dimension_numbers<[1], [0], [0], [1], [0, 0, 1, 1], [], []>} : vector<8x128xf32>, vector<128x512xf32>, vector<8x512xf32> -> vector<8x512xf32>
      %54 = arith.addf %52, %53 : vector<8x512xf32>
      %55 = vector.extract_strided_slice %54 {offsets = [0, 0], sizes = [8, 128], strides = [1, 1]} : vector<8x512xf32> to vector<8x128xf32>
      %56 = arith.negf %55 : vector<8x128xf32>
      %57 = math.exp %56 : vector<8x128xf32>
      %cst_60 = arith.constant 1.000000e+00 : f32
      %58 = vector.broadcast %cst_60 : f32 to vector<8x128xf32>
      %59 = arith.addf %58, %57 : vector<8x128xf32>
      %60 = arith.divf %58, %59 : vector<8x128xf32>
      %61 = vector.extract_strided_slice %54 {offsets = [0, 128], sizes = [8, 128], strides = [1, 1]} : vector<8x512xf32> to vector<8x128xf32>
      %62 = arith.negf %61 : vector<8x128xf32>
      %63 = math.exp %62 : vector<8x128xf32>
      %cst_61 = arith.constant 1.000000e+00 : f32
      %64 = vector.broadcast %cst_61 : f32 to vector<8x128xf32>
      %65 = arith.addf %64, %63 : vector<8x128xf32>
      %66 = arith.divf %64, %65 : vector<8x128xf32>
      %67 = vector.extract_strided_slice %54 {offsets = [0, 256], sizes = [8, 128], strides = [1, 1]} : vector<8x512xf32> to vector<8x128xf32>
      %68 = math.tanh %67 : vector<8x128xf32>
      %69 = vector.extract_strided_slice %54 {offsets = [0, 384], sizes = [8, 128], strides = [1, 1]} : vector<8x512xf32> to vector<8x128xf32>
      %70 = arith.negf %69 : vector<8x128xf32>
      %71 = math.exp %70 : vector<8x128xf32>
      %cst_62 = arith.constant 1.000000e+00 : f32
      %72 = vector.broadcast %cst_62 : f32 to vector<8x128xf32>
      %73 = arith.addf %72, %71 : vector<8x128xf32>
      %74 = arith.divf %72, %73 : vector<8x128xf32>
      %75 = arith.mulf %66, %arg19 : vector<8x128xf32>
      %76 = arith.mulf %60, %68 : vector<8x128xf32>
      %77 = arith.addf %75, %76 : vector<8x128xf32>
      %78 = math.tanh %77 : vector<8x128xf32>
      %79 = arith.mulf %74, %78 : vector<8x128xf32>
      %80 = arith.index_cast %50 : i32 to index
      %c0_63 = arith.constant 0 : index
      %81 = vector.load %arg15[%80, %c0_63] : memref<64x128xf32, #tpu.memory_space<vmem>>, vector<8x128xf32>
      tpu.vector_store %arg15[%80, %c0_63], %79 {strides = array<i32>} : memref<64x128xf32, #tpu.memory_space<vmem>>, vector<8x128xf32>,
      scf.yield %79, %77 : vector<8x128xf32>, vector<8x128xf32>
    }
    %c8_i32_42 = arith.constant 8 : i32
    %c1_43 = arith.constant 1 : index
    %c0_44 = arith.constant 0 : index
    %c0_45 = arith.constant 0 : index
    %35 = vector.load %arg13[%c1_43, %c0_44, %c0_45] : memref<2x8x128xf32, #tpu.memory_space<vmem>>, vector<1x8x128xf32>
    %36 = vector.shape_cast %35 : vector<1x8x128xf32> to vector<8x128xf32>
    %37 = vector.shape_cast %34#0 : vector<8x128xf32> to vector<1x8x128xf32>
    tpu.vector_store %arg13[%c1_43, %c0_44, %c0_45], %37 {strides = array<i32>} : memref<2x8x128xf32, #tpu.memory_space<vmem>>, vector<1x8x128xf32>,
    %c1_46 = arith.constant 1 : index
    %c0_47 = arith.constant 0 : index
    %c0_48 = arith.constant 0 : index
    %38 = vector.load %arg14[%c1_46, %c0_47, %c0_48] : memref<2x8x128xf32, #tpu.memory_space<vmem>>, vector<1x8x128xf32>
    %39 = vector.shape_cast %38 : vector<1x8x128xf32> to vector<8x128xf32>
    %40 = vector.shape_cast %34#1 : vector<8x128xf32> to vector<1x8x128xf32>
    tpu.vector_store %arg14[%c1_46, %c0_47, %c0_48], %40 {strides = array<i32>} : memref<2x8x128xf32, #tpu.memory_space<vmem>>, vector<1x8x128xf32>,
    %cst_49 = arith.constant 0.000000e+00 : f32
    %41 = vector.broadcast %cst_49 : f32 to vector<8x128xf32>
    %42 = arith.maximumf %34#0, %41 : vector<8x128xf32>
    %c0_50 = arith.constant 0 : index
    %c0_51 = arith.constant 0 : index
    %43 = vector.load %arg10[%c0_50, %c0_51] : memref<128x128xf32, #tpu.memory_space<vmem>>, vector<128x128xf32>
    %cst_52 = arith.constant dense<0.000000e+00> : vector<8x128xf32>
    %44 = tpu.matmul %42, %43, %cst_52 {dimension_numbers = #tpu.dot_dimension_numbers<[1], [0], [0], [1], [0, 0, 1, 1], [], []>} : vector<8x128xf32>, vector<128x128xf32>, vector<8x128xf32> -> vector<8x128xf32>
    %c0_53 = arith.constant 0 : index
    %c0_54 = arith.constant 0 : index
    %45 = vector.load %arg11[%c0_53, %c0_54] : memref<1x128xf32, #tpu.memory_space<vmem>>, vector<1x128xf32>
    %46 = vector.broadcast %45 : vector<1x128xf32> to vector<8x128xf32>
    %47 = arith.addf %44, %46 : vector<8x128xf32>
    %c0_55 = arith.constant 0 : index
    %c0_56 = arith.constant 0 : index
    %48 = vector.load %arg12[%c0_55, %c0_56] : memref<8x128xf32, #tpu.memory_space<vmem>>, vector<8x128xf32>
    tpu.vector_store %arg12[%c0_55, %c0_56], %47 {strides = array<i32>} : memref<8x128xf32, #tpu.memory_space<vmem>>, vector<8x128xf32>,
    return
  }
  func.func @transform_0(%arg0: i32) -> (i32, i32, i32) {
    %c0_i32 = arith.constant 0 : i32
    %c0_i32_0 = arith.constant 0 : i32
    %c0_i32_1 = arith.constant 0 : i32
    return %arg0, %c0_i32, %c0_i32_0 : i32, i32, i32
  }
  func.func @transform_1(%arg0: i32) -> (i32, i32, i32) {
    %c0_i32 = arith.constant 0 : i32
    %c0_i32_0 = arith.constant 0 : i32
    %c0_i32_1 = arith.constant 0 : i32
    return %c0_i32, %arg0, %c0_i32_0 : i32, i32, i32
  }
  func.func @transform_2(%arg0: i32) -> (i32, i32, i32) {
    %c0_i32 = arith.constant 0 : i32
    %c0_i32_0 = arith.constant 0 : i32
    %c0_i32_1 = arith.constant 0 : i32
    return %c0_i32, %arg0, %c0_i32_0 : i32, i32, i32
  }
  func.func @transform_3(%arg0: i32) -> (i32, i32) {
    %c0_i32 = arith.constant 0 : i32
    %c0_i32_0 = arith.constant 0 : i32
    %c0_i32_1 = arith.constant 0 : i32
    return %c0_i32, %c0_i32_0 : i32, i32
  }
  func.func @transform_4(%arg0: i32) -> (i32, i32) {
    %c0_i32 = arith.constant 0 : i32
    %c0_i32_0 = arith.constant 0 : i32
    %c0_i32_1 = arith.constant 0 : i32
    return %c0_i32, %c0_i32_0 : i32, i32
  }
  func.func @transform_5(%arg0: i32) -> (i32, i32) {
    %c0_i32 = arith.constant 0 : i32
    %c0_i32_0 = arith.constant 0 : i32
    %c0_i32_1 = arith.constant 0 : i32
    return %c0_i32, %c0_i32_0 : i32, i32
  }
  func.func @transform_6(%arg0: i32) -> (i32, i32) {
    %c0_i32 = arith.constant 0 : i32
    %c0_i32_0 = arith.constant 0 : i32
    %c0_i32_1 = arith.constant 0 : i32
    return %c0_i32, %c0_i32_0 : i32, i32
  }
  func.func @transform_7(%arg0: i32) -> (i32, i32) {
    %c0_i32 = arith.constant 0 : i32
    %c0_i32_0 = arith.constant 0 : i32
    %c0_i32_1 = arith.constant 0 : i32
    return %c0_i32, %c0_i32_0 : i32, i32
  }
  func.func @transform_8(%arg0: i32) -> (i32, i32) {
    %c0_i32 = arith.constant 0 : i32
    %c0_i32_0 = arith.constant 0 : i32
    %c0_i32_1 = arith.constant 0 : i32
    return %c0_i32, %c0_i32_0 : i32, i32
  }
  func.func @transform_9(%arg0: i32) -> (i32, i32) {
    %c0_i32 = arith.constant 0 : i32
    %c0_i32_0 = arith.constant 0 : i32
    %c0_i32_1 = arith.constant 0 : i32
    return %c0_i32, %c0_i32_0 : i32, i32
  }
  func.func @transform_10(%arg0: i32) -> (i32, i32) {
    %c0_i32 = arith.constant 0 : i32
    %c0_i32_0 = arith.constant 0 : i32
    %c0_i32_1 = arith.constant 0 : i32
    return %c0_i32, %c0_i32_0 : i32, i32
  }
  func.func @transform_11(%arg0: i32) -> (i32, i32) {
    %c0_i32 = arith.constant 0 : i32
    %c0_i32_0 = arith.constant 0 : i32
    return %arg0, %c0_i32 : i32, i32
  }
  func.func @transform_12(%arg0: i32) -> (i32, i32, i32) {
    %c0_i32 = arith.constant 0 : i32
    %c0_i32_0 = arith.constant 0 : i32
    %c0_i32_1 = arith.constant 0 : i32
    return %c0_i32, %arg0, %c0_i32_0 : i32, i32, i32
  }
  func.func @transform_13(%arg0: i32) -> (i32, i32, i32) {
    %c0_i32 = arith.constant 0 : i32
    %c0_i32_0 = arith.constant 0 : i32
    %c0_i32_1 = arith.constant 0 : i32
    return %c0_i32, %arg0, %c0_i32_0 : i32, i32, i32
  }
}

</mosaic_0001>

<bundles_post_ra>
// kernel: lstm_net_forward.1
= control target key start
LH: loop header
LB: loop body
LE: loop exit
PB: predicated region body
PF: predicated region fallthrough
CT: control target
= control target key end

     0   :  { %19 = vsyncpa [#allocation5], 0  ;;  %s2898_s0 = inlined_call_operand.vmem [shape: f32[1,64,128], index: 0, kind: input, shape index: {}]   ;;  %s2899_s1 = inlined_call_operand.vmem [shape: f32[2,8,128], index: 1, kind: input, shape index: {}]   ;;  %s2900_s2 = inlined_call_operand.vmem [shape: f32[2,8,128], index: 2, kind: input, shape index: {}]   ;;  %s2901_s3 = inlined_call_operand.hbm [shape: f32[128,512], index: 3, kind: input, shape index: {}]   ;;  %s2902_s4 = inlined_call_operand.hbm [shape: f32[128,512], index: 4, kind: input, shape index: {}]   ;;  %s2903_s5 = inlined_call_operand.vmem [shape: f32[1,512], index: 5, kind: input, shape index: {}]   ;;  %s2904_s6 = inlined_call_operand.hbm [shape: f32[128,512], index: 6, kind: input, shape index: {}]   ;;  %s2905_s7 = inlined_call_operand.hbm [shape: f32[128,512], index: 7, kind: input, shape index: {}]   ;;  %s2906_s8 = inlined_call_operand.vmem [shape: f32[1,512], index: 8, kind: input, shape index: {}]   ;;  %s2907_s9 = inlined_call_operand.vmem [shape: f32[128,128], index: 9, kind: input, shape index: {}]   ;;  %s2908_s10 = inlined_call_operand.vmem [shape: f32[1,128], index: 10, kind: input, shape index: {}]   ;;  %s2909_s11 = inlined_call_operand.vmem [shape: f32[8,128], index: 11, kind: output, shape index: {0}]   ;;  %s2910_s12 = inlined_call_operand.vmem [shape: f32[2,8,128], index: 12, kind: output, shape index: {1}]   ;;  %s2911_s13 = inlined_call_operand.vmem [shape: f32[2,8,128], index: 13, kind: output, shape index: {2}]  }
   0x1   :  { %20 = vsyncpa [#allocation7], 0 }
   0x2   :  { %21 = vsyncpa [#allocation10], 0  ;;  %s2044_s25 = smov [#allocation6]   ;;  %s2045_s27 = smov [#allocation4]  }
   0x3   :  { %s45_s26 = sshll.u32 %s2044_s25, 4  ;;  %s33_s28 = sshll.u32 %s2045_s27, 4  ;;  %s46_s26 = int_to_ptr.vmem [resolvable:$true] %s45_s26  ;;  %s2125_s28 = int_to_ptr.vmem [resolvable:$true] %s33_s28 }
   0x4   :  { %s1902_s14 = scalar_lea.hbm %s2902_s4, 8192 }
   0x5   :  { %p1903_p0 = scmp.ne.s32.totalorder %s2902_s4, %s1902_s14  ;;  %p1906_p1 = scmp.lt.u32.totalorder %s1902_s14, %s2902_s4 }
   0x7   :  { %p1908_p2 = pnand %p1906_p1, %p1903_p0 }
   0x9   :  { %1911 = shalt.err (!%p1908_p2)
}
   0xa   :  { %s1912_s19 = scalar_lea.vmem %s46_s26, 8192  ;;  %p1917_p4 = scmp.lt.s32.totalorder %s46_s26, %s46_s26 }
   0xb   :  { %p1913_p3 = scmp.ne.s32.totalorder %s46_s26, %s1912_s19  ;;  %p1918_p5 = scmp.lt.s32.totalorder %s1912_s19, %s1912_s19 }
   0xd   :  { %p1919_p6 = por %p1918_p5, %p1917_p4 }
   0xf   :  { %p1920_p7 = pnand %p1919_p6, %p1913_p3 }
  0x11   :  { %1923 = shalt.err (!%p1920_p7)
}
  0x12   :  { %s2046_s20 = smov 512   ;;  %s2047_s21 = smov 32  }
  0x13   :  { %51 = dma.hbm_to_vmem [thread:$0]  %s2902_s4, 8192, %s46_s26, [#allocation7], %s2046_s20, %s2046_s20, %s2047_s21  }
  0x14   :  { %s1924_s27 = scalar_lea.hbm %s2901_s3, 8192 }
  0x15   :  { %p1925_p8 = scmp.ne.s32.totalorder %s2901_s3, %s1924_s27  ;;  %p1928_p9 = scmp.lt.u32.totalorder %s1924_s27, %s2901_s3 }
  0x17   :  { %p1930_p10 = pnand %p1928_p9, %p1925_p8 }
  0x19   :  { %1933 = shalt.err (!%p1930_p10)
}
  0x1a   :  { %s1934_s16 = scalar_lea.vmem %s2125_s28, 8192  ;;  %p1939_p12 = scmp.lt.s32.totalorder %s2125_s28, %s2125_s28 }
  0x1b   :  { %p1935_p11 = scmp.ne.s32.totalorder %s2125_s28, %s1934_s16  ;;  %p1940_p13 = scmp.lt.s32.totalorder %s1934_s16, %s1934_s16 }
  0x1d   :  { %p1941_p0 = por %p1940_p13, %p1939_p12 }
  0x1f   :  { %p1942_p1 = pnand %p1941_p0, %p1935_p11 }
  0x21   :  { %1945 = shalt.err (!%p1942_p1)
}
  0x22   :  { %39 = dma.hbm_to_vmem [thread:$0]  %s2901_s3, 8192, %s2125_s28, [#allocation5], %s2046_s20, %s2046_s20, %s2047_s21  }
  0x23   :  { %s2048_s17 = smov [#allocation8]   ;;  %s2049_s19 = smov [#allocation9]  }
  0x24   :  { %s59_s18 = sshll.u32 %s2048_s17, 4  ;;  %s71_s22 = sshll.u32 %s2049_s19, 4  ;;  %s60_s18 = int_to_ptr.vmem [resolvable:$true] %s59_s18  ;;  %s2162_s22 = int_to_ptr.vmem [resolvable:$true] %s71_s22 }
  0x25   :  { %s1946_s25 = scalar_lea.hbm %s2904_s6, 8192 }
  0x26   :  { %p1947_p2 = scmp.ne.s32.totalorder %s2904_s6, %s1946_s25  ;;  %p1950_p3 = scmp.lt.u32.totalorder %s1946_s25, %s2904_s6 }
  0x28   :  { %p1952_p4 = pnand %p1950_p3, %p1947_p2 }
  0x2a   :  { %1955 = shalt.err (!%p1952_p4)
}
  0x2b   :  { %s1956_s3 = scalar_lea.vmem %s60_s18, 8192  ;;  %p1961_p6 = scmp.lt.s32.totalorder %s60_s18, %s60_s18 }
  0x2c   :  { %p1957_p5 = scmp.ne.s32.totalorder %s60_s18, %s1956_s3  ;;  %p1962_p7 = scmp.lt.s32.totalorder %s1956_s3, %s1956_s3 }
  0x2e   :  { %p1963_p8 = por %p1962_p7, %p1961_p6 }
  0x30   :  { %p1964_p9 = pnand %p1963_p8, %p1957_p5 }
  0x32   :  { %1967 = shalt.err (!%p1964_p9)
}
  0x33   :  { %65 = dma.hbm_to_vmem [thread:$0]  %s2904_s6, 8192, %s60_s18, [#allocation7], %s2046_s20, %s2046_s20, %s2047_s21  }
  0x34   :  { %s1968_s26 = scalar_lea.hbm %s2905_s7, 8192 }
  0x35   :  { %p1969_p10 = scmp.ne.s32.totalorder %s2905_s7, %s1968_s26  ;;  %p1972_p11 = scmp.lt.u32.totalorder %s1968_s26, %s2905_s7 }
  0x37   :  { %p1974_p12 = pnand %p1972_p11, %p1969_p10 }
  0x39   :  { %1977 = shalt.err (!%p1974_p12)
}
  0x3a   :  { %s1978_s25 = scalar_lea.vmem %s2162_s22, 8192  ;;  %p1983_p0 = scmp.lt.s32.totalorder %s2162_s22, %s2162_s22 }
  0x3b   :  { %p1979_p13 = scmp.ne.s32.totalorder %s2162_s22, %s1978_s25  ;;  %p1984_p1 = scmp.lt.s32.totalorder %s1978_s25, %s1978_s25 }
  0x3d   :  { %p1985_p2 = por %p1984_p1, %p1983_p0 }
  0x3f   :  { %p1986_p3 = pnand %p1985_p2, %p1979_p13 }
  0x41   :  { %1989 = shalt.err (!%p1986_p3)
}
  0x42   :  { %77 = dma.hbm_to_vmem [thread:$0]  %s2905_s7, 8192, %s2162_s22, [#allocation10], %s2046_s20, %s2046_s20, %s2047_s21  }
  0x43   :  { %2014 = dma.done.wait [#allocation5], 8192  }
  0x44   :  { %2015 = vsyncadd [#allocation5], 4294959104 }
  0x45   :  { %2016 = dma.done.wait [#allocation7], 16384  }
  0x46   :  { %2017 = vsyncadd [#allocation7], 4294950912 }
  0x47   :  { %2018 = dma.done.wait [#allocation10], 8192  }
  0x48   :  { %2019 = vsyncadd [#allocation10], 4294959104  ;;  %v2912_v0 = vmov 0.0   ;;  %v2201_v1 = vld [vmem:[#allocation6] sm:$0xff]  ;;  %v2203_v2 = vld [vmem:[#allocation6 + $0x8] sm:$0xff] }
  0x49   :  { %318 = vmatprep.mubr.f32.mxu0 %v2912_v0  ;;  %431 = vmatprep.mubr.f32.mxu1 %v2912_v0  ;;  %v2205_v3 = vld [vmem:[#allocation6 + $0x10] sm:$0xff]  ;;  %v2207_v4 = vld [vmem:[#allocation6 + $0x18] sm:$0xff]  ;;  %v2209_v5 = vld [vmem:[#allocation6 + $0x20] sm:$0xff] }
  0x4a   :  { %v2211_v6 = vld [vmem:[#allocation6 + $0x28] sm:$0xff]  ;;  %v2213_v7 = vld [vmem:[#allocation6 + $0x30] sm:$0xff]  ;;  %v2215_v8 = vld [vmem:[#allocation6 + $0x38] sm:$0xff] }
  0x4b   :  { %v2217_v9 = vld [vmem:[#allocation6 + $0x40] sm:$0xff]  ;;  %v2219_v10 = vld [vmem:[#allocation6 + $0x48] sm:$0xff]  ;;  %v2221_v11 = vld [vmem:[#allocation6 + $0x50] sm:$0xff] }
  0x4c   :  { %v2223_v12 = vld [vmem:[#allocation6 + $0x58] sm:$0xff]  ;;  %v2225_v13 = vld [vmem:[#allocation6 + $0x60] sm:$0xff]  ;;  %v2227_v14 = vld [vmem:[#allocation6 + $0x68] sm:$0xff] }
  0x4d   :  { %v2229_v15 = vld [vmem:[#allocation6 + $0x70] sm:$0xff]  ;;  %v2231_v16 = vld [vmem:[#allocation6 + $0x78] sm:$0xff]  ;;  %v2233_v17 = vld [vmem:[#allocation6 + $0x80] sm:$0xff] }
  0x4e   :  { %v2235_v18 = vld [vmem:[#allocation6 + $0x88] sm:$0xff]  ;;  %v2237_v19 = vld [vmem:[#allocation6 + $0x90] sm:$0xff]  ;;  %v2239_v20 = vld [vmem:[#allocation6 + $0x98] sm:$0xff] }
  0x4f   :  { %v2241_v21 = vld [vmem:[#allocation6 + $0xa0] sm:$0xff]  ;;  %v2243_v22 = vld [vmem:[#allocation6 + $0xa8] sm:$0xff]  ;;  %v2245_v23 = vld [vmem:[#allocation6 + $0xb0] sm:$0xff] }
  0x50   :  { %v2247_v24 = vld [vmem:[#allocation6 + $0xb8] sm:$0xff]  ;;  %v2249_v25 = vld [vmem:[#allocation6 + $0xc0] sm:$0xff]  ;;  %v2251_v26 = vld [vmem:[#allocation6 + $0xc8] sm:$0xff] }
  0x51   :  { %v2253_v27 = vld [vmem:[#allocation6 + $0xd0] sm:$0xff]  ;;  %v2255_v28 = vld [vmem:[#allocation6 + $0xd8] sm:$0xff]  ;;  %v2257_v29 = vld [vmem:[#allocation6 + $0xe0] sm:$0xff] }
  0x52   :  { %v2259_v30 = vld [vmem:[#allocation6 + $0xe8] sm:$0xff]  ;;  %v2261_v31 = vld [vmem:[#allocation6 + $0xf0] sm:$0xff]  ;;  %v2263_v32 = vld [vmem:[#allocation6 + $0xf8] sm:$0xff] }
  0x53   :  { %v2265_v33 = vld [vmem:[#allocation6 + $0x100] sm:$0xff]  ;;  %v2267_v34 = vld [vmem:[#allocation6 + $0x108] sm:$0xff]  ;;  %v2269_v35 = vld [vmem:[#allocation6 + $0x110] sm:$0xff] }
  0x54   :  { %2919 = vst [vmem:[#allocation14_spill] sm:$0xff] %v2269_v35  ;;  %v2271_v36 = vld [vmem:[#allocation6 + $0x118] sm:$0xff]  ;;  %v2273_v37 = vld [vmem:[#allocation6 + $0x120] sm:$0xff]  ;;  %v2275_v38 = vld [vmem:[#allocation6 + $0x128] sm:$0xff] }
  0x55   :  { %2920 = vst [vmem:[#allocation15_spill] sm:$0xff] %v2273_v37  ;;  %v2277_v39 = vld [vmem:[#allocation6 + $0x130] sm:$0xff]  ;;  %v2279_v40 = vld [vmem:[#allocation6 + $0x138] sm:$0xff]  ;;  %v2281_v41 = vld [vmem:[#allocation6 + $0x140] sm:$0xff] }
  0x56   :  { %2921 = vst [vmem:[#allocation16_spill] sm:$0xff] %v2277_v39  ;;  %2922 = vst [vmem:[#allocation17_spill] sm:$0xff] %v2281_v41  ;;  %v2283_v42 = vld [vmem:[#allocation6 + $0x148] sm:$0xff]  ;;  %v2285_v43 = vld [vmem:[#allocation6 + $0x150] sm:$0xff] }
  0x57   :  { %2923 = vst [vmem:[#allocation18_spill] sm:$0xff] %v2283_v42  ;;  %2924 = vst [vmem:[#allocation19_spill] sm:$0xff] %v2285_v43  ;;  %v2287_v44 = vld [vmem:[#allocation6 + $0x158] sm:$0xff]  ;;  %v2289_v45 = vld [vmem:[#allocation6 + $0x160] sm:$0xff] }
  0x58   :  { %2925 = vst [vmem:[#allocation20_spill] sm:$0xff] %v2287_v44  ;;  %2926 = vst [vmem:[#allocation21_spill] sm:$0xff] %v2289_v45  ;;  %v2291_v46 = vld [vmem:[#allocation6 + $0x168] sm:$0xff]  ;;  %v2293_v47 = vld [vmem:[#allocation6 + $0x170] sm:$0xff] }
  0x59   :  { %2927 = vst [vmem:[#allocation22_spill] sm:$0xff] %v2291_v46  ;;  %2928 = vst [vmem:[#allocation23_spill] sm:$0xff] %v2293_v47  ;;  %v2295_v48 = vld [vmem:[#allocation6 + $0x178] sm:$0xff]  ;;  %v2297_v49 = vld [vmem:[#allocation6 + $0x180] sm:$0xff] }
  0x5a   :  { %2929 = vst [vmem:[#allocation24_spill] sm:$0xff] %v2295_v48  ;;  %2930 = vst [vmem:[#allocation25_spill] sm:$0xff] %v2297_v49  ;;  %v2299_v50 = vld [vmem:[#allocation6 + $0x188] sm:$0xff]  ;;  %v2301_v51 = vld [vmem:[#allocation6 + $0x190] sm:$0xff] }
  0x5b   :  { %2931 = vst [vmem:[#allocation26_spill] sm:$0xff] %v2299_v50  ;;  %2932 = vst [vmem:[#allocation27_spill] sm:$0xff] %v2301_v51  ;;  %v2303_v52 = vld [vmem:[#allocation6 + $0x198] sm:$0xff]  ;;  %v2305_v53 = vld [vmem:[#allocation6 + $0x1a0] sm:$0xff] }
  0x5c   :  { %2933 = vst [vmem:[#allocation28_spill] sm:$0xff] %v2303_v52  ;;  %2934 = vst [vmem:[#allocation29_spill] sm:$0xff] %v2305_v53  ;;  %v2307_v54 = vld [vmem:[#allocation6 + $0x1a8] sm:$0xff]  ;;  %v2309_v55 = vld [vmem:[#allocation6 + $0x1b0] sm:$0xff] }
  0x5d   :  { %2935 = vst [vmem:[#allocation30_spill] sm:$0xff] %v2307_v54  ;;  %2936 = vst [vmem:[#allocation31_spill] sm:$0xff] %v2309_v55  ;;  %v2311_v56 = vld [vmem:[#allocation6 + $0x1b8] sm:$0xff]  ;;  %v2313_v57 = vld [vmem:[#allocation6 + $0x1c0] sm:$0xff] }
  0x5e   :  { %2937 = vst [vmem:[#allocation32_spill] sm:$0xff] %v2311_v56  ;;  %2938 = vst [vmem:[#allocation33_spill] sm:$0xff] %v2313_v57  ;;  %v2315_v58 = vld [vmem:[#allocation6 + $0x1c8] sm:$0xff]  ;;  %v2317_v59 = vld [vmem:[#allocation6 + $0x1d0] sm:$0xff] }
  0x5f   :  { %2939 = vst [vmem:[#allocation34_spill] sm:$0xff] %v2315_v58  ;;  %2940 = vst [vmem:[#allocation35_spill] sm:$0xff] %v2317_v59  ;;  %v2319_v60 = vld [vmem:[#allocation6 + $0x1d8] sm:$0xff]  ;;  %v2321_v61 = vld [vmem:[#allocation6 + $0x1e0] sm:$0xff] }
  0x60   :  { %2941 = vst [vmem:[#allocation36_spill] sm:$0xff] %v2319_v60  ;;  %2942 = vst [vmem:[#allocation37_spill] sm:$0xff] %v2321_v61  ;;  %v2323_v62 = vld [vmem:[#allocation6 + $0x1e8] sm:$0xff]  ;;  %v2325_v63 = vld [vmem:[#allocation6 + $0x1f0] sm:$0xff] }
  0x61   :  { %2943 = vst [vmem:[#allocation38_spill] sm:$0xff] %v2323_v62  ;;  %2944 = vst [vmem:[#allocation39_spill] sm:$0xff] %v2325_v63  ;;  %v2327_v0 = vld [vmem:[#allocation6 + $0x1f8] sm:$0xff]  ;;  %v2332_v55 = vld [vmem:[%s2899_s1] sm:$0xff]  }
  0x62   :  { %2945 = vst [vmem:[#allocation40_spill] sm:$0xff] %v2327_v0  ;;  %v2337_v57 = vld [vmem:[%s2900_s2] sm:$0xff]   ;;  %v105_v59 = vld [vmem:[#allocation4 + $0x8] sm:$0xff]  ;;  %v107_v51 = vld [vmem:[#allocation4 + $0x18] sm:$0xff] }
  0x63   :  { %v109_v60 = vld [vmem:[#allocation4 + $0x28] sm:$0xff]  ;;  %v111_v58 = vld [vmem:[#allocation4 + $0x38] sm:$0xff]  ;;  %v104_v62 = vld [vmem:[#allocation4] sm:$0xff] }
  0x64   :  { %v1531_v61 = vpack.c.bf16 %v109_v60, %v105_v59  ;;  %v108_v53 = vld [vmem:[#allocation4 + $0x20] sm:$0xff]  ;;  %v1563_v63 = vpack.c.bf16 %v111_v58, %v107_v51  ;;  %v106_v0 = vld [vmem:[#allocation4 + $0x10] sm:$0xff]  ;;  %v113_v52 = vld [vmem:[#allocation4 + $0x48] sm:$0xff] }
  0x65   :  { %v1533_v49 = vpack.c.bf16 %v108_v53, %v104_v62  ;;  %v110_v56 = vld [vmem:[#allocation4 + $0x30] sm:$0xff]  ;;  %v117_v43 = vld [vmem:[#allocation4 + $0x68] sm:$0xff]  ;;  %v115_v54 = vld [vmem:[#allocation4 + $0x58] sm:$0xff] }
  0x66   :  { %1532 = vmatprep.subr.bf16.mxu0 %v1531_v61  ;;  %v1565_v47 = vpack.c.bf16 %v110_v56, %v106_v0  ;;  %v119_v50 = vld [vmem:[#allocation4 + $0x78] sm:$0xff]  ;;  %1564 = vmatprep.subr.bf16.mxu1 %v1563_v63  ;;  %v1535_v45 = vpack.c.bf16 %v117_v43, %v113_v52  ;;  %v112_v48 = vld [vmem:[#allocation4 + $0x40] sm:$0xff]  ;;  %v114_v59 = vld [vmem:[#allocation4 + $0x50] sm:$0xff] }
  0x67   :  { %1534 = vmatpush1.bf16.msra.mxu0 %v1533_v49  ;;  %v1567_v41 = vpack.c.bf16 %v119_v50, %v115_v54  ;;  %v116_v44 = vld [vmem:[#allocation4 + $0x60] sm:$0xff]  ;;  %v118_v39 = vld [vmem:[#allocation4 + $0x70] sm:$0xff]  ;;  %v121_v51 = vld [vmem:[#allocation4 + $0x88] sm:$0xff] }
  0x68   :  { %1566 = vmatpush1.bf16.msra.mxu1 %v1565_v47  ;;  %v1537_v60 = vpack.c.bf16 %v116_v44, %v112_v48  ;;  %v125_v53 = vld [vmem:[#allocation4 + $0xa8] sm:$0xff]  ;;  %1536 = vmatprep.subr.bf16.mxu0 %v1535_v45  ;;  %v1569_v58 = vpack.c.bf16 %v118_v39, %v114_v59  ;;  %v123_v0 = vld [vmem:[#allocation4 + $0x98] sm:$0xff]  ;;  %v120_v62 = vld [vmem:[#allocation4 + $0x80] sm:$0xff] }
  0x69   :  { %1568 = vmatprep.subr.bf16.mxu1 %v1567_v41  ;;  %v1539_v61 = vpack.c.bf16 %v125_v53, %v121_v51  ;;  %v127_v56 = vld [vmem:[#allocation4 + $0xb8] sm:$0xff]  ;;  %v124_v63 = vld [vmem:[#allocation4 + $0xa0] sm:$0xff]  ;;  %v122_v49 = vld [vmem:[#allocation4 + $0x90] sm:$0xff] }
  0x6a   :  { %v1571_v35 = vpack.c.bf16 %v127_v56, %v123_v0  ;;  %v126_v43 = vld [vmem:[#allocation4 + $0xb0] sm:$0xff]  ;;  %v1541_v50 = vpack.c.bf16 %v124_v63, %v120_v62  ;;  %v129_v52 = vld [vmem:[#allocation4 + $0xc8] sm:$0xff]  ;;  %v131_v47 = vld [vmem:[#allocation4 + $0xd8] sm:$0xff] }
  0x6b   :  { %1538 = vmatpush1.bf16.msra.mxu0 %v1537_v60  ;;  %v133_v54 = vld [vmem:[#allocation4 + $0xe8] sm:$0xff]  ;;  %v1573_v44 = vpack.c.bf16 %v126_v43, %v122_v49  ;;  %v135_v45 = vld [vmem:[#allocation4 + $0xf8] sm:$0xff]  ;;  %v128_v41 = vld [vmem:[#allocation4 + $0xc0] sm:$0xff] }
  0x6c   :  { %1570 = vmatpush1.bf16.msra.mxu1 %v1569_v58  ;;  %1540 = vmatprep.subr.bf16.mxu0 %v1539_v61  ;;  %v1543_v48 = vpack.c.bf16 %v133_v54, %v129_v52  ;;  %v132_v39 = vld [vmem:[#allocation4 + $0xe0] sm:$0xff]  ;;  %v1575_v59 = vpack.c.bf16 %v135_v45, %v131_v47  ;;  %v130_v51 = vld [vmem:[#allocation4 + $0xd0] sm:$0xff]  ;;  %v137_v0 = vld [vmem:[#allocation4 + $0x108] sm:$0xff] }
  0x6d   :  { %1572 = vmatprep.subr.bf16.mxu1 %v1571_v35  ;;  %v134_v53 = vld [vmem:[#allocation4 + $0xf0] sm:$0xff]  ;;  %v141_v56 = vld [vmem:[#allocation4 + $0x128] sm:$0xff]  ;;  %v139_v46 = vld [vmem:[#allocation4 + $0x118] sm:$0xff]  ;;  %v1545_v60 = vpack.c.bf16 %v132_v39, %v128_v41 }
  0x6e   :  { %v143_v42 = vld [vmem:[#allocation4 + $0x138] sm:$0xff]  ;;  %v1577_v62 = vpack.c.bf16 %v134_v53, %v130_v51  ;;  %v1547_v58 = vpack.c.bf16 %v141_v56, %v137_v0  ;;  %v136_v61 = vld [vmem:[#allocation4 + $0x100] sm:$0xff]  ;;  %v138_v49 = vld [vmem:[#allocation4 + $0x110] sm:$0xff] }
  0x6f   :  { %1542 = vmatpush1.bf16.msra.mxu0 %v1541_v50  ;;  %v140_v63 = vld [vmem:[#allocation4 + $0x120] sm:$0xff]  ;;  %v1579_v43 = vpack.c.bf16 %v143_v42, %v139_v46  ;;  %v142_v52 = vld [vmem:[#allocation4 + $0x130] sm:$0xff]  ;;  %v145_v35 = vld [vmem:[#allocation4 + $0x148] sm:$0xff] }
  0x70   :  { %1574 = vmatpush1.bf16.msra.mxu1 %v1573_v44  ;;  %1544 = vmatprep.subr.bf16.mxu0 %v1543_v48  ;;  %v149_v54 = vld [vmem:[#allocation4 + $0x168] sm:$0xff]  ;;  %v147_v47 = vld [vmem:[#allocation4 + $0x158] sm:$0xff]  ;;  %v1549_v37 = vpack.c.bf16 %v140_v63, %v136_v61  ;;  %v1581_v50 = vpack.c.bf16 %v142_v52, %v138_v49  ;;  %v144_v44 = vld [vmem:[#allocation4 + $0x140] sm:$0xff] }
  0x71   :  { %1576 = vmatprep.subr.bf16.mxu1 %v1575_v59  ;;  %v151_v45 = vld [vmem:[#allocation4 + $0x178] sm:$0xff]  ;;  %v1551_v41 = vpack.c.bf16 %v149_v54, %v145_v35  ;;  %v148_v48 = vld [vmem:[#allocation4 + $0x160] sm:$0xff]  ;;  %v146_v39 = vld [vmem:[#allocation4 + $0x150] sm:$0xff] }
  0x72   :  { %v1583_v51 = vpack.c.bf16 %v151_v45, %v147_v47  ;;  %v150_v53 = vld [vmem:[#allocation4 + $0x170] sm:$0xff]  ;;  %v153_v0 = vld [vmem:[#allocation4 + $0x188] sm:$0xff]  ;;  %v155_v42 = vld [vmem:[#allocation4 + $0x198] sm:$0xff]  ;;  %v1553_v56 = vpack.c.bf16 %v148_v48, %v144_v44 }
  0x73   :  { %1546 = vmatpush1.bf16.msra.mxu0 %v1545_v60  ;;  %v157_v59 = vld [vmem:[#allocation4 + $0x1a8] sm:$0xff]  ;;  %v159_v46 = vld [vmem:[#allocation4 + $0x1b8] sm:$0xff]  ;;  %v1585_v60 = vpack.c.bf16 %v150_v53, %v146_v39  ;;  %v154_v63 = vld [vmem:[#allocation4 + $0x190] sm:$0xff] }
  0x74   :  { %1578 = vmatpush1.bf16.msra.mxu1 %v1577_v62  ;;  %1548 = vmatprep.subr.bf16.mxu0 %v1547_v58  ;;  %v1555_v61 = vpack.c.bf16 %v157_v59, %v153_v0  ;;  %v152_v62 = vld [vmem:[#allocation4 + $0x180] sm:$0xff]  ;;  %v1587_v49 = vpack.c.bf16 %v159_v46, %v155_v42  ;;  %v158_v52 = vld [vmem:[#allocation4 + $0x1b0] sm:$0xff]  ;;  %v161_v35 = vld [vmem:[#allocation4 + $0x1c8] sm:$0xff]  ;;  %v2946_v42 = vmov 0.0  }
  0x75   :  { %1580 = vmatprep.subr.bf16.mxu1 %v1579_v43  ;;  %v156_v58 = vld [vmem:[#allocation4 + $0x1a0] sm:$0xff]  ;;  %v165_v43 = vld [vmem:[#allocation4 + $0x1e8] sm:$0xff]  ;;  %v163_v54 = vld [vmem:[#allocation4 + $0x1d8] sm:$0xff] }
  0x76   :  { %v167_v47 = vld [vmem:[#allocation4 + $0x1f8] sm:$0xff]  ;;  %v1557_v45 = vpack.c.bf16 %v156_v58, %v152_v62  ;;  %v1559_v44 = vpack.c.bf16 %v165_v43, %v161_v35  ;;  %v162_v39 = vld [vmem:[#allocation4 + $0x1d0] sm:$0xff]  ;;  %v96_v59 = vld [vmem:[%s2898_s0] sm:$0xff] }
  0x77   :  { %1550 = vmatpush1.bf16.msra.mxu0 %v1549_v37  ;;  %v1589_v37 = vpack.c.bf16 %v158_v52, %v154_v63  ;;  %v1591_v48 = vpack.c.bf16 %v167_v47, %v163_v54  ;;  %v166_v53 = vld [vmem:[#allocation4 + $0x1f0] sm:$0xff]  ;;  %v97_v46 = vld [vmem:[%s2898_s0 + $0x8] sm:$0xff]  ;;  %v103_v63 = vld [vmem:[%s2898_s0 + $0x38] sm:$0xff] }
  0x78   :  { %1582 = vmatpush1.bf16.msra.mxu1 %v1581_v50  ;;  %1552 = vmatprep.subr.bf16.mxu0 %v1551_v41  ;;  %v160_v50 = vld [vmem:[#allocation4 + $0x1c0] sm:$0xff]  ;;  %v1593_v0 = vpack.c.bf16 %v166_v53, %v162_v39  ;;  %v101_v62 = vld [vmem:[%s2898_s0 + $0x28] sm:$0xff]  ;;  %v102_v58 = vld [vmem:[%s2898_s0 + $0x30] sm:$0xff] }
  0x79   :  { %1584 = vmatprep.subr.bf16.mxu1 %v1583_v51  ;;  %v164_v41 = vld [vmem:[#allocation4 + $0x1e0] sm:$0xff] }
  0x7a   :  { %v1561_v51 = vpack.c.bf16 %v164_v41, %v160_v50  ;;  %v232_v43 = vld [vmem:[%s2903_s5] sm:$0xf] }
  0x7b   :  { %1554 = vmatpush1.bf16.msra.mxu0 %v1553_v56  ;;  %v98_v56 = vld [vmem:[%s2898_s0 + $0x10] sm:$0xff] }
  0x7c   :  { %1586 = vmatpush1.bf16.msra.mxu1 %v1585_v60  ;;  %1556 = vmatprep.subr.bf16.mxu0 %v1555_v61  ;;  %v99_v60 = vld [vmem:[%s2898_s0 + $0x18] sm:$0xff]  ;;  %v100_v61 = vld [vmem:[%s2898_s0 + $0x20] sm:$0xff]  ;;  %s2440_s0 = smov 0  }
  0x7d   :  { %1588 = vmatprep.subr.bf16.mxu1 %v1587_v49  ;;  %v234_v49 = vlaneseq }
  0x7f   :  { %1558 = vmatpush1.bf16.msra.mxu0 %v1557_v45  ;;  %v2377_v52 = vshrl.u32 %v234_v49, 7 }
  0x80   :  { %1590 = vmatpush1.bf16.msra.mxu1 %v1589_v37  ;;  %1560 = vmatprep.subr.bf16.mxu0 %v1559_v44 }
  0x81   :  { %1592 = vmatprep.subr.bf16.mxu1 %v1591_v48  ;;  %v2918_v35 = vsub.s32 0, %v2377_v52  ;;  %v2917_v54 = vsub.s32 2, %v2377_v52  ;;  %v2916_v47 = vsub.s32 1, %v2377_v52  ;;  %v2915_v45 = vsub.s32 3, %v2377_v52 }
  0x83   :  { %1562 = vmatpush1.bf16.msra.mxu0 %v1561_v51  ;;  %v2388_v37 = vrot.slane %v232_v43, %v2918_v35  ;;  %v2392_v44 = vrot.slane %v232_v43, %v2917_v54  ;;  %v2396_v50 = vrot.slane %v232_v43, %v2916_v47  ;;  %v2400_v41 = vrot.slane %v232_v43, %v2915_v45 }
  0x84   :  { %1594 = vmatpush1.bf16.msra.mxu1 %v1593_v0 }
  0x86   :  { %319 = vmatmul.mubr.f32.vlgmr.msra.gmra.mrb[0].mxu0 %v96_v59 }
  0x87   :  { %432 = vmatmul.mubr.f32.vlgmr.msra.gmra.mrb[0].mxu1 %v96_v59  ;;  %324 = vmatprep.mubr.f32.mxu0 %v2946_v42 }
  0x88   :  { %437 = vmatprep.mubr.f32.mxu1 %v2946_v42 }
  0x8a   :  { %325 = vmatmul.mubr.f32.gmra.mrb[2].mxu0 %v97_v46 }
  0x8b   :  { %438 = vmatmul.mubr.f32.gmra.mrb[2].mxu1 %v97_v46  ;;  %330 = vmatprep.mubr.f32.mxu0 %v2946_v42 }
  0x8c   :  { %443 = vmatprep.mubr.f32.mxu1 %v2946_v42 }
  0x8e   :  { %331 = vmatmul.mubr.f32.gmra.mrb[4].mxu0 %v98_v56 }
  0x8f   :  { %444 = vmatmul.mubr.f32.gmra.mrb[4].mxu1 %v98_v56  ;;  %336 = vmatprep.mubr.f32.mxu0 %v2946_v42 }
  0x90   :  { %449 = vmatprep.mubr.f32.mxu1 %v2946_v42 }
  0x92   :  { %337 = vmatmul.mubr.f32.gmra.mrb[6].mxu0 %v99_v60 }
  0x93   :  { %450 = vmatmul.mubr.f32.gmra.mrb[6].mxu1 %v99_v60  ;;  %342 = vmatprep.mubr.f32.mxu0 %v2946_v42 }
  0x94   :  { %455 = vmatprep.mubr.f32.mxu1 %v2946_v42 }
  0x96   :  { %343 = vmatmul.mubr.f32.gmra.mrb[8].mxu0 %v100_v61 }
  0x97   :  { %456 = vmatmul.mubr.f32.gmra.mrb[8].mxu1 %v100_v61  ;;  %348 = vmatprep.mubr.f32.mxu0 %v2946_v42 }
  0x98   :  { %461 = vmatprep.mubr.f32.mxu1 %v2946_v42 }
  0x9a   :  { %349 = vmatmul.mubr.f32.gmra.mrb[10].mxu0 %v101_v62 }
  0x9b   :  { %462 = vmatmul.mubr.f32.gmra.mrb[10].mxu1 %v101_v62  ;;  %354 = vmatprep.mubr.f32.mxu0 %v2946_v42 }
  0x9c   :  { %467 = vmatprep.mubr.f32.mxu1 %v2946_v42 }
  0x9e   :  { %355 = vmatmul.mubr.f32.gmra.mrb[12].mxu0 %v102_v58 }
  0x9f   :  { %468 = vmatmul.mubr.f32.gmra.mrb[12].mxu1 %v102_v58  ;;  %360 = vmatprep.mubr.f32.mxu0 %v2946_v42 }
  0xa0   :  { %473 = vmatprep.mubr.f32.mxu1 %v2946_v42 }
  0xa2   :  { %361 = vmatmul.mubr.f32.gmra.mrb[14].mxu0 %v103_v63 }
  0xa3   :  { %474 = vmatmul.mubr.f32.gmra.mrb[14].mxu1 %v103_v63 }
 0x159   :  { %v320_v48 = vpop.f32.mrb[0].mxu0 }
 0x15a   :  { %v321_v39 = vadd.f32 %v320_v48, %v2388_v37  ;;  %v433_v53 = vpop.f32.mrb[0].mxu1  ;;  %v322_v51 = vpop.f32.mrb[1].mxu0 }
 0x15b   :  { %v434_v0 = vadd.f32 %v433_v53, %v2392_v44  ;;  %v323_v59 = vadd.f32 %v322_v51, %v2396_v50  ;;  %v435_v42 = vpop.f32.mrb[1].mxu1 }
 0x15c   :  { %480 = vst [vmem:[#allocation3] sm:$0xff] %v321_v39  ;;  %v436_v46 = vadd.f32 %v435_v42, %v2400_v41 }
 0x15d   :  { %482 = vst [vmem:[#allocation3 + $0x10] sm:$0xff] %v434_v0  ;;  %481 = vst [vmem:[#allocation3 + $0x8] sm:$0xff] %v323_v59  ;;  %v326_v56 = vpop.f32.mrb[2].mxu0 }
 0x15e   :  { %483 = vst [vmem:[#allocation3 + $0x18] sm:$0xff] %v436_v46  ;;  %v327_v60 = vadd.f32 %v326_v56, %v2388_v37  ;;  %v439_v61 = vpop.f32.mrb[2].mxu1  ;;  %v328_v62 = vpop.f32.mrb[3].mxu0 }
 0x15f   :  { %v440_v58 = vadd.f32 %v439_v61, %v2392_v44  ;;  %v329_v63 = vadd.f32 %v328_v62, %v2396_v50  ;;  %v441_v49 = vpop.f32.mrb[3].mxu1 }
 0x160   :  { %484 = vst [vmem:[#allocation3 + $0x20] sm:$0xff] %v327_v60  ;;  %v442_v43 = vadd.f32 %v441_v49, %v2400_v41 }
 0x161   :  { %486 = vst [vmem:[#allocation3 + $0x30] sm:$0xff] %v440_v58  ;;  %485 = vst [vmem:[#allocation3 + $0x28] sm:$0xff] %v329_v63  ;;  %v332_v48 = vpop.f32.mrb[4].mxu0 }
 0x162   :  { %487 = vst [vmem:[#allocation3 + $0x38] sm:$0xff] %v442_v43  ;;  %v333_v39 = vadd.f32 %v332_v48, %v2388_v37  ;;  %v445_v53 = vpop.f32.mrb[4].mxu1  ;;  %v334_v51 = vpop.f32.mrb[5].mxu0 }
 0x163   :  { %v446_v0 = vadd.f32 %v445_v53, %v2392_v44  ;;  %v335_v59 = vadd.f32 %v334_v51, %v2396_v50  ;;  %v447_v42 = vpop.f32.mrb[5].mxu1 }
 0x164   :  { %488 = vst [vmem:[#allocation3 + $0x40] sm:$0xff] %v333_v39  ;;  %v448_v46 = vadd.f32 %v447_v42, %v2400_v41 }
 0x165   :  { %490 = vst [vmem:[#allocation3 + $0x50] sm:$0xff] %v446_v0  ;;  %489 = vst [vmem:[#allocation3 + $0x48] sm:$0xff] %v335_v59  ;;  %v338_v56 = vpop.f32.mrb[6].mxu0 }
 0x166   :  { %491 = vst [vmem:[#allocation3 + $0x58] sm:$0xff] %v448_v46  ;;  %v339_v60 = vadd.f32 %v338_v56, %v2388_v37  ;;  %v451_v61 = vpop.f32.mrb[6].mxu1  ;;  %v340_v62 = vpop.f32.mrb[7].mxu0 }
 0x167   :  { %v452_v58 = vadd.f32 %v451_v61, %v2392_v44  ;;  %v341_v63 = vadd.f32 %v340_v62, %v2396_v50  ;;  %v453_v49 = vpop.f32.mrb[7].mxu1 }
 0x168   :  { %492 = vst [vmem:[#allocation3 + $0x60] sm:$0xff] %v339_v60  ;;  %v454_v43 = vadd.f32 %v453_v49, %v2400_v41 }
 0x169   :  { %494 = vst [vmem:[#allocation3 + $0x70] sm:$0xff] %v452_v58  ;;  %493 = vst [vmem:[#allocation3 + $0x68] sm:$0xff] %v341_v63  ;;  %v344_v48 = vpop.f32.mrb[8].mxu0 }
 0x16a   :  { %495 = vst [vmem:[#allocation3 + $0x78] sm:$0xff] %v454_v43  ;;  %v345_v39 = vadd.f32 %v344_v48, %v2388_v37  ;;  %v457_v53 = vpop.f32.mrb[8].mxu1  ;;  %v346_v51 = vpop.f32.mrb[9].mxu0 }
 0x16b   :  { %v458_v0 = vadd.f32 %v457_v53, %v2392_v44  ;;  %v347_v59 = vadd.f32 %v346_v51, %v2396_v50  ;;  %v459_v42 = vpop.f32.mrb[9].mxu1 }
 0x16c   :  { %496 = vst [vmem:[#allocation3 + $0x80] sm:$0xff] %v345_v39  ;;  %v460_v46 = vadd.f32 %v459_v42, %v2400_v41 }
 0x16d   :  { %498 = vst [vmem:[#allocation3 + $0x90] sm:$0xff] %v458_v0  ;;  %497 = vst [vmem:[#allocation3 + $0x88] sm:$0xff] %v347_v59  ;;  %v350_v56 = vpop.f32.mrb[10].mxu0 }
 0x16e   :  { %499 = vst [vmem:[#allocation3 + $0x98] sm:$0xff] %v460_v46  ;;  %v351_v60 = vadd.f32 %v350_v56, %v2388_v37  ;;  %v463_v61 = vpop.f32.mrb[10].mxu1  ;;  %v352_v62 = vpop.f32.mrb[11].mxu0 }
 0x16f   :  { %v464_v58 = vadd.f32 %v463_v61, %v2392_v44  ;;  %v353_v63 = vadd.f32 %v352_v62, %v2396_v50  ;;  %v465_v49 = vpop.f32.mrb[11].mxu1 }
 0x170   :  { %500 = vst [vmem:[#allocation3 + $0xa0] sm:$0xff] %v351_v60  ;;  %v466_v43 = vadd.f32 %v465_v49, %v2400_v41 }
 0x171   :  { %502 = vst [vmem:[#allocation3 + $0xb0] sm:$0xff] %v464_v58  ;;  %501 = vst [vmem:[#allocation3 + $0xa8] sm:$0xff] %v353_v63  ;;  %v356_v48 = vpop.f32.mrb[12].mxu0 }
 0x172   :  { %503 = vst [vmem:[#allocation3 + $0xb8] sm:$0xff] %v466_v43  ;;  %v357_v39 = vadd.f32 %v356_v48, %v2388_v37  ;;  %v469_v53 = vpop.f32.mrb[12].mxu1  ;;  %v358_v51 = vpop.f32.mrb[13].mxu0 }
 0x173   :  { %v470_v0 = vadd.f32 %v469_v53, %v2392_v44  ;;  %v359_v59 = vadd.f32 %v358_v51, %v2396_v50  ;;  %v471_v42 = vpop.f32.mrb[13].mxu1 }
 0x174   :  { %504 = vst [vmem:[#allocation3 + $0xc0] sm:$0xff] %v357_v39  ;;  %v472_v46 = vadd.f32 %v471_v42, %v2400_v41 }
 0x175   :  { %506 = vst [vmem:[#allocation3 + $0xd0] sm:$0xff] %v470_v0  ;;  %505 = vst [vmem:[#allocation3 + $0xc8] sm:$0xff] %v359_v59  ;;  %v362_v56 = vpop.f32.mrb[14].mxu0 }
 0x176   :  { %507 = vst [vmem:[#allocation3 + $0xd8] sm:$0xff] %v472_v46  ;;  %v363_v60 = vadd.f32 %v362_v56, %v2388_v37  ;;  %v475_v61 = vpop.f32.mrb[14].mxu1  ;;  %v364_v62 = vpop.f32.mrb[15].mxu0 }
 0x177   :  { %v476_v58 = vadd.f32 %v475_v61, %v2392_v44  ;;  %v365_v63 = vadd.f32 %v364_v62, %v2396_v50  ;;  %v477_v49 = vpop.f32.mrb[15].mxu1 }
 0x178   :  { %508 = vst [vmem:[#allocation3 + $0xe0] sm:$0xff] %v363_v60  ;;  %v478_v43 = vadd.f32 %v477_v49, %v2400_v41 }
 0x179   :  { %510 = vst [vmem:[#allocation3 + $0xf0] sm:$0xff] %v476_v58  ;;  %509 = vst [vmem:[#allocation3 + $0xe8] sm:$0xff] %v365_v63 }
 0x17a   :  { %511 = vst [vmem:[#allocation3 + $0xf8] sm:$0xff] %v478_v43 }
 0x17b LB: > { %v1595_v37 = vpack.c.bf16 %v2211_v6, %v2203_v2  ;;  %v1597_v44 = vpack.c.bf16 %v2209_v5, %v2201_v1  ;;  %v1599_v50 = vpack.c.bf16 %v2227_v14, %v2219_v10  ;;  %v1627_v41 = vpack.c.bf16 %v2215_v8, %v2207_v4  ;;  %v2947_v43 = vld [vmem:[#allocation15_spill] sm:$0xff]  ;;  %s1460_s5 = sshll.u32 %s2030_s0, 3  ;;  %s519_s0 = sadd.s32 1, %s2030_s0   ;;  %s2030_s0 = sphi %s2440_s0, %s519_s0   ;;  %v2026_v55 = vphi %v2332_v55, %v2975_v55   ;;  %v2022_v57 = vphi %v2337_v57, %v2974_v57  }
 0x17c   : > { %v1629_v48 = vpack.c.bf16 %v2213_v7, %v2205_v3  ;;  %v1601_v39 = vpack.c.bf16 %v2225_v13, %v2217_v9  ;;  %v1631_v53 = vpack.c.bf16 %v2231_v16, %v2223_v12  ;;  %v1603_v51 = vpack.c.bf16 %v2243_v22, %v2235_v18  ;;  %s523_s20 = sshra.s32 %s1460_s5, 3  ;;  %s702_s27 = scalar_lea.vmem [#allocation2], %s1460_s5 }
 0x17d   : > { %1596 = vmatprep.subr.bf16.mxu0 %v1595_v37  ;;  %1628 = vmatprep.subr.bf16.mxu1 %v1627_v41  ;;  %v1633_v0 = vpack.c.bf16 %v2229_v15, %v2221_v11  ;;  %v1635_v59 = vpack.c.bf16 %v2247_v24, %v2239_v20  ;;  %v2051_v42 = vmov 0.0   ;;  %v1605_v46 = vpack.c.bf16 %v2241_v21, %v2233_v17  ;;  %s1477_s21 = sshll.u32 %s523_s20, 5  ;;  %p516_p4 = scmp.ge.s32.totalorder %s519_s0, 8  }
 0x17e   : > { %1598 = vmatpush1.bf16.msra.mxu0 %v1597_v44  ;;  %1630 = vmatpush1.bf16.msra.mxu1 %v1629_v48  ;;  %v1607_v56 = vpack.c.bf16 %v2259_v30, %v2251_v26  ;;  %v1637_v60 = vpack.c.bf16 %v2245_v23, %v2237_v19  ;;  %v1639_v61 = vpack.c.bf16 %v2263_v32, %v2255_v28  ;;  %v2948_v44 = vld [vmem:[#allocation18_spill] sm:$0xff]  ;;  %s527_s22 = scalar_lea.vmem [#allocation3], %s1477_s21  ;;  %v2544_v1 = vld [vmem:[#allocation9 + $0x18] sm:$0xff] (%p516_p4)  ;;  %v2548_v4 = vld [vmem:[#allocation9 + $0x28] sm:$0xff] (%p516_p4) }
 0x17f   : > { %1600 = vmatprep.subr.bf16.mxu0 %v1599_v50  ;;  %1632 = vmatprep.subr.bf16.mxu1 %v1631_v53  ;;  %v1609_v62 = vpack.c.bf16 %v2257_v29, %v2249_v25  ;;  %v1611_v58 = vpack.c.bf16 %v2275_v38, %v2267_v34  ;;  %v1641_v63 = vpack.c.bf16 %v2261_v31, %v2253_v27  ;;  %v2949_v50 = vld [vmem:[#allocation22_spill] sm:$0xff]  ;;  %v2550_v5 = vld [vmem:[#allocation9 + $0x30] sm:$0xff] (%p516_p4)  ;;  %v2552_v6 = vld [vmem:[#allocation9 + $0x38] sm:$0xff] (%p516_p4) }
 0x180   : > { %596 = vmatprep.mubr.f32.mxu0 %v2051_v42  ;;  %667 = vmatprep.mubr.f32.mxu1 %v2051_v42  ;;  %v1643_v49 = vpack.c.bf16 %v2279_v40, %v2271_v36  ;;  %v1613_v37 = vpack.c.bf16 %v2947_v43, %v2265_v33  ;;  %v1615_v41 = vpack.c.bf16 %v2949_v50, %v2948_v44  ;;  %v2950_v48 = vld [vmem:[#allocation14_spill] sm:$0xff]  ;;  %v2954_v42 = vld [vmem:[#allocation17_spill] sm:$0xff]  ;;  %v2959_v43 = vld [vmem:[#allocation23_spill] sm:$0xff] }
 0x181   : > { %v2961_v50 = vld [vmem:[#allocation32_spill] sm:$0xff]  ;;  %v2546_v3 = vld [vmem:[#allocation9 + $0x20] sm:$0xff] (%p516_p4)  ;;  %v2556_v8 = vld [vmem:[#allocation9 + $0x48] sm:$0xff] (%p516_p4) }
 0x182   : > { %1602 = vmatpush1.bf16.msra.mxu0 %v1601_v39  ;;  %1634 = vmatpush1.bf16.msra.mxu1 %v1633_v0  ;;  %v2951_v39 = vld [vmem:[#allocation16_spill] sm:$0xff]  ;;  %v2554_v7 = vld [vmem:[#allocation9 + $0x40] sm:$0xff] (%p516_p4)  ;;  %v2560_v10 = vld [vmem:[#allocation9 + $0x58] sm:$0xff] (%p516_p4) }
 0x183   : > { %1604 = vmatprep.subr.bf16.mxu0 %v1603_v51  ;;  %1636 = vmatprep.subr.bf16.mxu1 %v1635_v59  ;;  %v1645_v53 = vpack.c.bf16 %v2951_v39, %v2950_v48  ;;  %v2952_v51 = vld [vmem:[#allocation20_spill] sm:$0xff]  ;;  %v2963_v39 = vld [vmem:[#allocation29_spill] sm:$0xff]  ;;  %v2562_v11 = vld [vmem:[#allocation9 + $0x60] sm:$0xff] (%p516_p4) }
 0x184   : > { %v2953_v0 = vld [vmem:[#allocation24_spill] sm:$0xff]  ;;  %v2564_v12 = vld [vmem:[#allocation9 + $0x68] sm:$0xff] (%p516_p4)  ;;  %v2568_v14 = vld [vmem:[#allocation9 + $0x78] sm:$0xff] (%p516_p4) }
 0x185   : > { %v1647_v59 = vpack.c.bf16 %v2953_v0, %v2952_v51  ;;  %v2965_v0 = vld [vmem:[#allocation38_spill] sm:$0xff]  ;;  %v2558_v9 = vld [vmem:[#allocation9 + $0x50] sm:$0xff] (%p516_p4)  ;;  %v2572_v16 = vld [vmem:[#allocation9 + $0x88] sm:$0xff] (%p516_p4) }
 0x186   : > { %1606 = vmatpush1.bf16.msra.mxu0 %v1605_v46  ;;  %1638 = vmatpush1.bf16.msra.mxu1 %v1637_v60  ;;  %v2955_v46 = vld [vmem:[#allocation21_spill] sm:$0xff]  ;;  %v2956_v60 = vld [vmem:[#allocation26_spill] sm:$0xff]  ;;  %v2566_v13 = vld [vmem:[#allocation9 + $0x70] sm:$0xff] (%p516_p4) }
 0x187   : > { %1608 = vmatprep.subr.bf16.mxu0 %v1607_v56  ;;  %1640 = vmatprep.subr.bf16.mxu1 %v1639_v61  ;;  %v1617_v56 = vpack.c.bf16 %v2955_v46, %v2954_v42  ;;  %v2957_v61 = vld [vmem:[#allocation30_spill] sm:$0xff]  ;;  %v2966_v42 = vld [vmem:[#allocation27_spill] sm:$0xff]  ;;  %v2574_v17 = vld [vmem:[#allocation9 + $0x90] sm:$0xff] (%p516_p4) }
 0x188   :  { %v2570_v15 = vld [vmem:[#allocation9 + $0x80] sm:$0xff] (%p516_p4)  ;;  %v2576_v18 = vld [vmem:[#allocation9 + $0x98] sm:$0xff] (%p516_p4)  ;;  %v2580_v20 = vld [vmem:[#allocation9 + $0xa8] sm:$0xff] (%p516_p4) }
 0x189   :  { %v2578_v19 = vld [vmem:[#allocation9 + $0xa0] sm:$0xff] (%p516_p4)  ;;  %v2582_v21 = vld [vmem:[#allocation9 + $0xb0] sm:$0xff] (%p516_p4)  ;;  %v2584_v22 = vld [vmem:[#allocation9 + $0xb8] sm:$0xff] (%p516_p4) }
 0x18a   : > { %1610 = vmatpush1.bf16.msra.mxu0 %v1609_v62  ;;  %1642 = vmatpush1.bf16.msra.mxu1 %v1641_v63  ;;  %v1619_v62 = vpack.c.bf16 %v2957_v61, %v2956_v60  ;;  %v2960_v63 = vld [vmem:[#allocation28_spill] sm:$0xff]  ;;  %v2586_v23 = vld [vmem:[#allocation9 + $0xc0] sm:$0xff] (%p516_p4)  ;;  %v2588_v24 = vld [vmem:[#allocation9 + $0xc8] sm:$0xff] (%p516_p4) }
 0x18b   : > { %1612 = vmatprep.subr.bf16.mxu0 %v1611_v58  ;;  %1644 = vmatprep.subr.bf16.mxu1 %v1643_v49  ;;  %v2958_v58 = vld [vmem:[#allocation19_spill] sm:$0xff]  ;;  %v1651_v48 = vpack.c.bf16 %v2961_v50, %v2960_v63  ;;  %v2962_v49 = vld [vmem:[#allocation25_spill] sm:$0xff]  ;;  %v2968_v60 = vld [vmem:[#allocation36_spill] sm:$0xff] }
 0x18c   : > { %v1649_v44 = vpack.c.bf16 %v2959_v43, %v2958_v58  ;;  %v1621_v51 = vpack.c.bf16 %v2963_v39, %v2962_v49  ;;  %v2970_v58 = vld [vmem:[#allocation33_spill] sm:$0xff]  ;;  %v2973_v63 = vld [vmem:[#allocation39_spill] sm:$0xff]  ;;  %v2590_v25 = vld [vmem:[#allocation9 + $0xd0] sm:$0xff] (%p516_p4) }
 0x18d   :  { %v2592_v26 = vld [vmem:[#allocation9 + $0xd8] sm:$0xff] (%p516_p4)  ;;  %v2594_v27 = vld [vmem:[#allocation9 + $0xe0] sm:$0xff] (%p516_p4)  ;;  %v2596_v28 = vld [vmem:[#allocation9 + $0xe8] sm:$0xff] (%p516_p4) }
 0x18e   : > { %1614 = vmatpush1.bf16.msra.mxu0 %v1613_v37  ;;  %1646 = vmatpush1.bf16.msra.mxu1 %v1645_v53  ;;  %v2964_v37 = vld [vmem:[#allocation34_spill] sm:$0xff]  ;;  %v2967_v53 = vld [vmem:[#allocation31_spill] sm:$0xff]  ;;  %v2598_v29 = vld [vmem:[#allocation9 + $0xf0] sm:$0xff] (%p516_p4) }
 0x18f   : > { %1616 = vmatprep.subr.bf16.mxu0 %v1615_v41  ;;  %1648 = vmatprep.subr.bf16.mxu1 %v1647_v59  ;;  %v1623_v41 = vpack.c.bf16 %v2965_v0, %v2964_v37  ;;  %v1653_v46 = vpack.c.bf16 %v2967_v53, %v2966_v42  ;;  %v2969_v59 = vld [vmem:[#allocation40_spill] sm:$0xff]  ;;  %v2600_v30 = vld [vmem:[#allocation9 + $0xf8] sm:$0xff] (%p516_p4)  ;;  %v2602_v31 = vld [vmem:[#allocation9 + $0x100] sm:$0xff] (%p516_p4) }
 0x190   : > { %v1655_v61 = vpack.c.bf16 %v2969_v59, %v2968_v60  ;;  %2977 = vst [vmem:[#allocation14_spill] sm:$0xff] (%p516_p4), %v2602_v31  ;;  %v2604_v32 = vld [vmem:[#allocation9 + $0x108] sm:$0xff] (%p516_p4)  ;;  %v2606_v33 = vld [vmem:[#allocation9 + $0x110] sm:$0xff] (%p516_p4)  ;;  %v2608_v34 = vld [vmem:[#allocation9 + $0x118] sm:$0xff] (%p516_p4) }
 0x191   :  { %2978 = vst [vmem:[#allocation15_spill] sm:$0xff] (%p516_p4), %v2606_v33  ;;  %v2610_v36 = vld [vmem:[#allocation9 + $0x120] sm:$0xff] (%p516_p4)  ;;  %v2612_v38 = vld [vmem:[#allocation9 + $0x128] sm:$0xff] (%p516_p4)  ;;  %v2614_v40 = vld [vmem:[#allocation9 + $0x130] sm:$0xff] (%p516_p4) }
 0x192   : > { %1618 = vmatpush1.bf16.msra.mxu0 %v1617_v56  ;;  %1650 = vmatpush1.bf16.msra.mxu1 %v1649_v44  ;;  %v2971_v56 = vld [vmem:[#allocation37_spill] sm:$0xff]  ;;  %v528_v44 = vld [vmem:[%s527_s22] sm:$0xff]  ;;  %2979 = vst [vmem:[#allocation16_spill] sm:$0xff] (%p516_p4), %v2610_v36  ;;  %2980 = vst [vmem:[#allocation17_spill] sm:$0xff] (%p516_p4), %v2614_v40 }
 0x193   : > { %1620 = vmatprep.subr.bf16.mxu0 %v1619_v62  ;;  %1652 = vmatprep.subr.bf16.mxu1 %v1651_v48  ;;  %v1625_v43 = vpack.c.bf16 %v2971_v56, %v2970_v58  ;;  %v2972_v62 = vld [vmem:[#allocation35_spill] sm:$0xff]  ;;  %v2654_v45 = vld [vmem:[#allocation9 + $0x1d0] sm:$0xff] (%p516_p4)  ;;  %v2656_v47 = vld [vmem:[#allocation9 + $0x1d8] sm:$0xff] (%p516_p4) }
 0x194   : > { %v1657_v50 = vpack.c.bf16 %v2973_v63, %v2972_v62  ;;  %v529_v48 = vld [vmem:[%s527_s22 + $0x8] sm:$0xff]  ;;  %2999 = vst [vmem:[#allocation36_spill] sm:$0xff] (%p516_p4), %v2654_v45  ;;  %3000 = vst [vmem:[#allocation37_spill] sm:$0xff] (%p516_p4), %v2656_v47  ;;  %v2658_v54 = vld [vmem:[#allocation9 + $0x1e0] sm:$0xff] (%p516_p4) }
 0x195   :  { %3001 = vst [vmem:[#allocation38_spill] sm:$0xff] (%p516_p4), %v2658_v54  ;;  %v2660_v35 = vld [vmem:[#allocation9 + $0x1e8] sm:$0xff] (%p516_p4)  ;;  %v717_v47 = vld [vmem:[#allocation8 + $0x58] sm:$0xff] (%p516_p4)  ;;  %v728_v33 = vld [vmem:[#allocation8 + $0xb0] sm:$0xff] (%p516_p4) }
 0x196   : > { %1622 = vmatpush1.bf16.msra.mxu0 %v1621_v51  ;;  %1654 = vmatpush1.bf16.msra.mxu1 %v1653_v46  ;;  %v531_v46 = vld [vmem:[%s527_s22 + $0x18] sm:$0xff]  ;;  %3002 = vst [vmem:[#allocation39_spill] sm:$0xff] (%p516_p4), %v2660_v35  ;;  %v715_v45 = vld [vmem:[#allocation8 + $0x48] sm:$0xff] (%p516_p4)  ;;  %v714_v35 = vld [vmem:[#allocation8 + $0x40] sm:$0xff] (%p516_p4) }
 0x197   : > { %1624 = vmatprep.subr.bf16.mxu0 %v1623_v41  ;;  %1656 = vmatprep.subr.bf16.mxu1 %v1655_v61  ;;  %v727_v40 = vld [vmem:[#allocation8 + $0xa8] sm:$0xff] (%p516_p4) }
 0x19a   : > { %1626 = vmatpush1.bf16.msra.mxu0 %v1625_v43  ;;  %1658 = vmatpush1.bf16.msra.mxu1 %v1657_v50 }
 0x19d   : > { %597 = vmatmul.mubr.f32.vlgmr.msra.gmra.mrb[0].mxu0 %v2026_v55  ;;  %668 = vmatmul.mubr.f32.vlgmr.msra.gmra.mrb[0].mxu1 %v2026_v55  ;;  %v530_v55 = vld [vmem:[%s527_s22 + $0x10] sm:$0xff] }
 0x270   : > { %v598_v49 = vpop.f32.mrb[0].mxu0  ;;  %v669_v0 = vpop.f32.mrb[0].mxu1 }
 0x271   : > { %v674_v39 = vadd.f32 %v598_v49, %v528_v44  ;;  %v600_v51 = vpop.f32.mrb[1].mxu0  ;;  %v671_v42 = vpop.f32.mrb[1].mxu1  ;;  %v676_v61 = vadd.f32 %v669_v0, %v530_v55 }
 0x272   : > { %v675_v37 = vadd.f32 %v600_v51, %v529_v48  ;;  %v677_v60 = vadd.f32 %v671_v42, %v531_v46  ;;  %v711_v46 = vld [vmem:[#allocation8 + $0x28] sm:$0xff] (%p516_p4) }
 0x273   : > { %v1463_v41 = vmul.f32 -1.442695, %v674_v39 }
 0x274   : > { %v1464_v53 = vmul.f32 -1.442695, %v675_v37  ;;  %v1465_v59 = vmul.f32 -1.442695, %v677_v60  ;;  %v2536_v60 = vld [vmem:[#allocation9] sm:$0xff] (%p516_p4) }
 0x275   : > { %1870 = vpow2.f32 %v1463_v41 }
 0x276   : > { %1872 = vpow2.f32 %v1464_v53  ;;  %v707_v53 = vld [vmem:[#allocation8 + $0x8] sm:$0xff] (%p516_p4) }
 0x277   : > { %1874 = vpow2.f32 %v1465_v59  ;;  %v2540_v59 = vld [vmem:[#allocation9 + $0x8] sm:$0xff] (%p516_p4)  ;;  %v1659_v2 = vpack.c.bf16 (%p516_p4), %v711_v46, %v707_v53  ;;  %v2648_v53 = vld [vmem:[#allocation9 + $0x1b8] sm:$0xff] (%p516_p4)  ;;  %v2650_v46 = vld [vmem:[#allocation9 + $0x1c0] sm:$0xff] (%p516_p4) }
 0x278   : > { %1876 = vtanh.f32 %v676_v61  ;;  %v2542_v61 = vld [vmem:[#allocation9 + $0x10] sm:$0xff] (%p516_p4)  ;;  %2996 = vst [vmem:[#allocation33_spill] sm:$0xff] (%p516_p4), %v2648_v53  ;;  %2997 = vst [vmem:[#allocation34_spill] sm:$0xff] (%p516_p4), %v2650_v46 }
 0x279   :  { %1660 = vmatprep.subr.bf16.mxu0 (%p516_p4), %v1659_v2  ;;  %v2652_v2 = vld [vmem:[#allocation9 + $0x1c8] sm:$0xff] (%p516_p4)  ;;  %v708_v46 = vld [vmem:[#allocation8 + $0x10] sm:$0xff] (%p516_p4) }
 0x27a   :  { %2998 = vst [vmem:[#allocation35_spill] sm:$0xff] (%p516_p4), %v2652_v2 }
 0x27f   : > { %v1871_v58 = vpop.eup %1870 }
 0x280   : > { %v1873_v56 = vpop.eup %1872  ;;  %v681_v43 = vadd.f32 1.0, %v1871_v58  ;;  %v2618_v58 = vld [vmem:[#allocation9 + $0x140] sm:$0xff] (%p516_p4) }
 0x281   : > { %v687_v62 = vadd.f32 1.0, %v1873_v56  ;;  %v1875_v63 = vpop.eup %1874  ;;  %2981 = vst [vmem:[#allocation18_spill] sm:$0xff] (%p516_p4), %v2618_v58  ;;  %v2620_v56 = vld [vmem:[#allocation9 + $0x148] sm:$0xff] (%p516_p4)  ;;  %v718_v58 = vld [vmem:[#allocation8 + $0x60] sm:$0xff] (%p516_p4) }
 0x282   : > { %1878 = vrcp.f32 %v681_v43  ;;  %v1877_v50 = vpop.eup %1876  ;;  %v694_v48 = vadd.f32 1.0, %v1875_v63  ;;  %2982 = vst [vmem:[#allocation19_spill] sm:$0xff] (%p516_p4), %v2620_v56  ;;  %v2622_v43 = vld [vmem:[#allocation9 + $0x150] sm:$0xff] (%p516_p4)  ;;  %v2626_v63 = vld [vmem:[#allocation9 + $0x160] sm:$0xff] (%p516_p4)  ;;  %v745_v56 = vld [vmem:[#allocation8 + $0x138] sm:$0xff] (%p516_p4) }
 0x283   : > { %1880 = vrcp.f32 %v687_v62  ;;  %2983 = vst [vmem:[#allocation20_spill] sm:$0xff] (%p516_p4), %v2622_v43  ;;  %v2624_v62 = vld [vmem:[#allocation9 + $0x158] sm:$0xff] (%p516_p4)  ;;  %2985 = vst [vmem:[#allocation22_spill] sm:$0xff] (%p516_p4), %v2626_v63  ;;  %v712_v43 = vld [vmem:[#allocation8 + $0x30] sm:$0xff] (%p516_p4) }
 0x284   : > { %1882 = vrcp.f32 %v694_v48  ;;  %2984 = vst [vmem:[#allocation21_spill] sm:$0xff] (%p516_p4), %v2624_v62  ;;  %v2632_v48 = vld [vmem:[#allocation9 + $0x178] sm:$0xff] (%p516_p4)  ;;  %v720_v62 = vld [vmem:[#allocation8 + $0x70] sm:$0xff] (%p516_p4) }
 0x285   :  { %2988 = vst [vmem:[#allocation25_spill] sm:$0xff] (%p516_p4), %v2632_v48  ;;  %v721_v63 = vld [vmem:[#allocation8 + $0x78] sm:$0xff] (%p516_p4)  ;;  %v716_v48 = vld [vmem:[#allocation8 + $0x50] sm:$0xff] (%p516_p4) }
 0x28c   : > { %v1879_v44 = vpop.eup %1878 }
 0x28d   : > { %v1881_v49 = vpop.eup %1880  ;;  %v698_v39 = vmul.f32 %v1879_v44, %v1877_v50  ;;  %v2628_v50 = vld [vmem:[#allocation9 + $0x168] sm:$0xff] (%p516_p4)  ;;  %v2630_v44 = vld [vmem:[#allocation9 + $0x170] sm:$0xff] (%p516_p4) }
 0x28e   : > { %v697_v51 = vmul.f32 %v2022_v57, %v1881_v49  ;;  %v1883_v0 = vpop.eup %1882  ;;  %2986 = vst [vmem:[#allocation23_spill] sm:$0xff] (%p516_p4), %v2628_v50  ;;  %2987 = vst [vmem:[#allocation24_spill] sm:$0xff] (%p516_p4), %v2630_v44  ;;  %v2634_v49 = vld [vmem:[#allocation9 + $0x180] sm:$0xff] (%p516_p4)  ;;  %v731_v50 = vld [vmem:[#allocation8 + $0xc8] sm:$0xff] (%p516_p4) }
 0x28f   :  { %2989 = vst [vmem:[#allocation26_spill] sm:$0xff] (%p516_p4), %v2634_v49  ;;  %v709_v49 = vld [vmem:[#allocation8 + $0x18] sm:$0xff] (%p516_p4)  ;;  %v710_v44 = vld [vmem:[#allocation8 + $0x20] sm:$0xff] (%p516_p4) }
 0x290   : > { %v699_v37 = vadd.f32 %v698_v39, %v697_v51   ;;  %v2636_v39 = vld [vmem:[#allocation9 + $0x188] sm:$0xff] (%p516_p4)  ;;  %v2638_v51 = vld [vmem:[#allocation9 + $0x190] sm:$0xff] (%p516_p4) }
 0x291   :  { %2990 = vst [vmem:[#allocation27_spill] sm:$0xff] (%p516_p4), %v2636_v39  ;;  %2991 = vst [vmem:[#allocation28_spill] sm:$0xff] (%p516_p4), %v2638_v51  ;;  %v2662_v51 = vld [vmem:[#allocation9 + $0x1f0] sm:$0xff] (%p516_p4)  ;;  %v719_v39 = vld [vmem:[#allocation8 + $0x68] sm:$0xff] (%p516_p4) }
 0x292   : > { %1884 = vtanh.f32 %v699_v37  ;;  %v2974_v57 = vmov %v699_v37  ;;  %705 = vst [vmem:[%s2911_s13] sm:$0xff] (%p516_p4), %v699_v37  ;;  %v2640_v37 = vld [vmem:[#allocation9 + $0x198] sm:$0xff] (%p516_p4)  ;;  %3003 = vst [vmem:[#allocation40_spill] sm:$0xff] (%p516_p4), %v2662_v51  ;;  %v1663_v54 = vpack.c.bf16 (%p516_p4), %v719_v39, %v715_v45  ;;  %v1695_v51 = vpack.c.bf16 (%p516_p4), %v721_v63, %v717_v47  ;;  %v726_v45 = vld [vmem:[#allocation8 + $0xa0] sm:$0xff] (%p516_p4) }
 0x293   :  { %v2616_v57 = vld [vmem:[#allocation9 + $0x138] sm:$0xff] (%p516_p4)  ;;  %2992 = vst [vmem:[#allocation29_spill] sm:$0xff] (%p516_p4), %v2640_v37  ;;  %v706_v37 = vld [vmem:[#allocation8] sm:$0xff] (%p516_p4)  ;;  %v724_v39 = vld [vmem:[#allocation8 + $0x90] sm:$0xff] (%p516_p4) }
 0x294   :  { %v1661_v2 = vpack.c.bf16 (%p516_p4), %v710_v44, %v706_v37  ;;  %v725_v44 = vld [vmem:[#allocation8 + $0x98] sm:$0xff] (%p516_p4)  ;;  %v1701_v47 = vpack.c.bf16 (%p516_p4), %v728_v33, %v724_v39  ;;  %v742_v33 = vld [vmem:[#allocation8 + $0x120] sm:$0xff] (%p516_p4)  ;;  %v747_v39 = vld [vmem:[#allocation8 + $0x148] sm:$0xff] (%p516_p4) }
 0x295   :  { %v737_v63 = vld [vmem:[#allocation8 + $0xf8] sm:$0xff] (%p516_p4) }
 0x296   :  { %1662 = vmatpush1.bf16.msra.mxu0 (%p516_p4), %v1661_v2  ;;  %v735_v2 = vld [vmem:[#allocation8 + $0xe8] sm:$0xff] (%p516_p4) }
 0x297   :  { %1664 = vmatprep.subr.bf16.mxu0 (%p516_p4), %v1663_v54  ;;  %v730_v54 = vld [vmem:[#allocation8 + $0xc0] sm:$0xff] (%p516_p4) }
 0x299   :  { %518 = sbr.rel (!%p516_p4) target bundleno = 379 (0x17b), region = 118 }
 0x29c   : > { %v1885_v41 = vpop.eup %1884 }
 0x29d   : > { %v701_v42 = vmul.f32 %v1885_v41, %v1883_v0   ;;  %v2642_v0 = vld [vmem:[#allocation9 + $0x1a0] sm:$0xff] (%p516_p4)  ;;  %v2644_v41 = vld [vmem:[#allocation9 + $0x1a8] sm:$0xff] (%p516_p4) }
 0x29e   :  { %2993 = vst [vmem:[#allocation30_spill] sm:$0xff] (%p516_p4), %v2642_v0  ;;  %2994 = vst [vmem:[#allocation31_spill] sm:$0xff] (%p516_p4), %v2644_v41  ;;  %v2664_v0 = vld [vmem:[#allocation9 + $0x1f8] sm:$0xff] (%p516_p4)  ;;  %v1693_v41 = vpack.c.bf16 (%p516_p4), %v712_v43, %v708_v46 }
 0x29f   : > { %703 = vst [vmem:[%s702_s27] sm:$0xff] %v701_v42  ;;  %v2975_v55 = vmov %v701_v42  ;;  %704 = vst [vmem:[%s2910_s12] sm:$0xff] (%p516_p4), %v701_v42  ;;  %v2646_v42 = vld [vmem:[#allocation9 + $0x1b0] sm:$0xff] (%p516_p4)  ;;  %v729_v43 = vld [vmem:[#allocation8 + $0xb8] sm:$0xff] (%p516_p4) }
 0x2a0   :  { %v2976_v55 = vmov 0.0   ;;  %2995 = vst [vmem:[#allocation32_spill] sm:$0xff] %v2646_v42  ;;  %3004 = vst [vmem:[#allocation41_spill] sm:$0xff] %v2664_v0  ;;  %v713_v42 = vld [vmem:[#allocation8 + $0x38] sm:$0xff]  ;;  %v1665_v0 = vpack.c.bf16 %v718_v58, %v714_v35  ;;  %v1699_v46 = vpack.c.bf16 %v729_v43, %v725_v44  ;;  %v743_v44 = vld [vmem:[#allocation8 + $0x128] sm:$0xff] }
 0x2a1   :  { %928 = vmatprep.mubr.f32.mxu0 %v2976_v55  ;;  %1041 = vmatprep.mubr.f32.mxu1 %v2976_v55  ;;  %v1691_v53 = vpack.c.bf16 %v713_v42, %v709_v49  ;;  %v723_v49 = vld [vmem:[#allocation8 + $0x88] sm:$0xff]  ;;  %v1697_v42 = vpack.c.bf16 %v720_v62, %v716_v48  ;;  %v733_v58 = vld [vmem:[#allocation8 + $0xd8] sm:$0xff]  ;;  %v1671_v62 = vpack.c.bf16 %v735_v2, %v731_v50  ;;  %v744_v50 = vld [vmem:[#allocation8 + $0x130] sm:$0xff] }
 0x2a2   :  { %v1667_v37 = vpack.c.bf16 %v727_v40, %v723_v49  ;;  %1666 = vmatpush1.bf16.msra.mxu0 %v1665_v0  ;;  %v1703_v48 = vpack.c.bf16 %v737_v63, %v733_v58  ;;  %v732_v40 = vld [vmem:[#allocation8 + $0xd0] sm:$0xff]  ;;  %v739_v49 = vld [vmem:[#allocation8 + $0x108] sm:$0xff]  ;;  %v741_v43 = vld [vmem:[#allocation8 + $0x118] sm:$0xff] }
 0x2a3   :  { %1692 = vmatprep.subr.bf16.mxu1 %v1691_v53  ;;  %v722_v53 = vld [vmem:[#allocation8 + $0x80] sm:$0xff]  ;;  %v751_v2 = vld [vmem:[#allocation8 + $0x168] sm:$0xff]  ;;  %v749_v58 = vld [vmem:[#allocation8 + $0x158] sm:$0xff] }
 0x2a4   :  { %1694 = vmatpush1.bf16.msra.mxu1 %v1693_v41  ;;  %v1669_v35 = vpack.c.bf16 %v726_v45, %v722_v53  ;;  %1668 = vmatprep.subr.bf16.mxu0 %v1667_v37  ;;  %v736_v41 = vld [vmem:[#allocation8 + $0xf0] sm:$0xff]  ;;  %v738_v53 = vld [vmem:[#allocation8 + $0x100] sm:$0xff]  ;;  %v1675_v45 = vpack.c.bf16 %v743_v44, %v739_v49  ;;  %v1707_v37 = vpack.c.bf16 %v745_v56, %v741_v43  ;;  %v753_v63 = vld [vmem:[#allocation8 + $0x178] sm:$0xff] }
 0x2a5   :  { %1696 = vmatprep.subr.bf16.mxu1 %v1695_v51  ;;  %v734_v51 = vld [vmem:[#allocation8 + $0xe0] sm:$0xff]  ;;  %v1677_v36 = vpack.c.bf16 %v742_v33, %v738_v53  ;;  %v759_v56 = vld [vmem:[#allocation8 + $0x1a8] sm:$0xff]  ;;  %v761_v49 = vld [vmem:[#allocation8 + $0x1b8] sm:$0xff] }
 0x2a6   :  { %1670 = vmatpush1.bf16.msra.mxu0 %v1669_v35  ;;  %v1673_v0 = vpack.c.bf16 %v734_v51, %v730_v54  ;;  %v746_v35 = vld [vmem:[#allocation8 + $0x140] sm:$0xff]  ;;  %v1679_v54 = vpack.c.bf16 %v751_v2, %v747_v39  ;;  %v1711_v51 = vpack.c.bf16 %v753_v63, %v749_v58  ;;  %v765_v39 = vld [vmem:[#allocation8 + $0x1d8] sm:$0xff] }
 0x2a7   :  { %1672 = vmatprep.subr.bf16.mxu0 %v1671_v62  ;;  %v748_v62 = vld [vmem:[#allocation8 + $0x150] sm:$0xff]  ;;  %v769_v2 = vld [vmem:[#allocation8 + $0x1f8] sm:$0xff] }
 0x2a8   :  { %1698 = vmatpush1.bf16.msra.mxu1 %v1697_v42  ;;  %v1705_v42 = vpack.c.bf16 %v736_v41, %v732_v40  ;;  %v755_v40 = vld [vmem:[#allocation8 + $0x188] sm:$0xff]  ;;  %v757_v41 = vld [vmem:[#allocation8 + $0x198] sm:$0xff] }
 0x2a9   :  { %1700 = vmatprep.subr.bf16.mxu1 %v1699_v46  ;;  %v740_v46 = vld [vmem:[#allocation8 + $0x110] sm:$0xff]  ;;  %v1683_v53 = vpack.c.bf16 %v759_v56, %v755_v40  ;;  %v1715_v33 = vpack.c.bf16 %v761_v49, %v757_v41  ;;  %v835_v40 = vld [vmem:[#allocation2] sm:$0xff]  ;;  %v836_v56 = vld [vmem:[#allocation2 + $0x8] sm:$0xff] }
 0x2aa   :  { %1674 = vmatpush1.bf16.msra.mxu0 %v1673_v0  ;;  %v1709_v31 = vpack.c.bf16 %v744_v50, %v740_v46  ;;  %v754_v0 = vld [vmem:[#allocation8 + $0x180] sm:$0xff]  ;;  %v763_v46 = vld [vmem:[#allocation8 + $0x1c8] sm:$0xff]  ;;  %v837_v41 = vld [vmem:[#allocation2 + $0x10] sm:$0xff] }
 0x2ab   :  { %1676 = vmatprep.subr.bf16.mxu0 %v1675_v45  ;;  %v756_v45 = vld [vmem:[#allocation8 + $0x190] sm:$0xff]  ;;  %v767_v50 = vld [vmem:[#allocation8 + $0x1e8] sm:$0xff]  ;;  %v838_v49 = vld [vmem:[#allocation2 + $0x18] sm:$0xff] }
 0x2ac   :  { %1702 = vmatpush1.bf16.msra.mxu1 %v1701_v47  ;;  %v750_v47 = vld [vmem:[#allocation8 + $0x160] sm:$0xff] }
 0x2ad   :  { %1704 = vmatprep.subr.bf16.mxu1 %v1703_v48  ;;  %v752_v48 = vld [vmem:[#allocation8 + $0x170] sm:$0xff]  ;;  %v1681_v44 = vpack.c.bf16 %v750_v47, %v746_v35  ;;  %v1719_v35 = vpack.c.bf16 %v769_v2, %v765_v39  ;;  %v766_v47 = vld [vmem:[#allocation8 + $0x1e0] sm:$0xff]  ;;  %v3007_v39 = vsub.s32 1, %v2377_v52 }
 0x2ae   :  { %1678 = vmatpush1.bf16.msra.mxu0 %v1677_v36  ;;  %v1713_v43 = vpack.c.bf16 %v752_v48, %v748_v62  ;;  %v762_v36 = vld [vmem:[#allocation8 + $0x1c0] sm:$0xff] }
 0x2af   :  { %1680 = vmatprep.subr.bf16.mxu0 %v1679_v54  ;;  %v764_v54 = vld [vmem:[#allocation8 + $0x1d0] sm:$0xff]  ;;  %v1689_v62 = vpack.c.bf16 %v766_v47, %v762_v36 }
 0x2b0   :  { %1706 = vmatpush1.bf16.msra.mxu1 %v1705_v42  ;;  %v758_v42 = vld [vmem:[#allocation8 + $0x1a0] sm:$0xff] }
 0x2b1   :  { %1708 = vmatprep.subr.bf16.mxu1 %v1707_v37  ;;  %v760_v37 = vld [vmem:[#allocation8 + $0x1b0] sm:$0xff]  ;;  %v1685_v58 = vpack.c.bf16 %v758_v42, %v754_v0  ;;  %v842_v42 = vld [vmem:[#allocation2 + $0x38] sm:$0xff] }
 0x2b2   :  { %1682 = vmatpush1.bf16.msra.mxu0 %v1681_v44  ;;  %v1717_v63 = vpack.c.bf16 %v760_v37, %v756_v45  ;;  %v839_v44 = vld [vmem:[#allocation2 + $0x20] sm:$0xff]  ;;  %v841_v0 = vld [vmem:[#allocation2 + $0x30] sm:$0xff]  ;;  %v3005_v37 = vsub.s32 0, %v2377_v52 }
 0x2b3   :  { %1684 = vmatprep.subr.bf16.mxu0 %v1683_v53  ;;  %v2683_v53 = vld [vmem:[%s2899_s1 + $0x8] sm:$0xff]   ;;  %v834_v45 = vld [vmem:[%s2906_s8] sm:$0xf]  ;;  %s2747_s1 = smov 0  }
 0x2b4   :  { %1710 = vmatpush1.bf16.msra.mxu1 %v1709_v31  ;;  %v1687_v31 = vpack.c.bf16 %v767_v50, %v763_v46  ;;  %v3006_v46 = vsub.s32 2, %v2377_v52  ;;  %v2703_v2 = vrot.slane %v834_v45, %v3007_v39 }
 0x2b5   :  { %1712 = vmatprep.subr.bf16.mxu1 %v1711_v51  ;;  %v768_v51 = vld [vmem:[#allocation8 + $0x1f0] sm:$0xff] }
 0x2b6   :  { %1686 = vmatpush1.bf16.msra.mxu0 %v1685_v58  ;;  %v1721_v48 = vpack.c.bf16 %v768_v51, %v764_v54  ;;  %v2699_v50 = vrot.slane %v834_v45, %v3006_v46  ;;  %v3008_v58 = vsub.s32 3, %v2377_v52 }
 0x2b7   :  { %1688 = vmatprep.subr.bf16.mxu0 %v1687_v31 }
 0x2b8   :  { %1714 = vmatpush1.bf16.msra.mxu1 %v1713_v43  ;;  %v840_v43 = vld [vmem:[#allocation2 + $0x28] sm:$0xff] }
 0x2b9   :  { %1716 = vmatprep.subr.bf16.mxu1 %v1715_v33  ;;  %v2688_v33 = vld [vmem:[%s2900_s2 + $0x8] sm:$0xff]  }
 0x2ba   :  { %1690 = vmatpush1.bf16.msra.mxu0 %v1689_v62 }
 0x2bc   :  { %1718 = vmatpush1.bf16.msra.mxu1 %v1717_v63  ;;  %v2707_v63 = vrot.slane %v834_v45, %v3008_v58 }
 0x2bd   :  { %1720 = vmatprep.subr.bf16.mxu1 %v1719_v35  ;;  %929 = vmatmul.mubr.f32.vlgmr.msra.gmra.mrb[0].mxu0 %v835_v40 }
 0x2be   :  { %934 = vmatprep.mubr.f32.mxu0 %v2976_v55 }
 0x2c0   :  { %1722 = vmatpush1.bf16.msra.mxu1 %v1721_v48 }
 0x2c1   :  { %935 = vmatmul.mubr.f32.gmra.mrb[2].mxu0 %v836_v56 }
 0x2c2   :  { %940 = vmatprep.mubr.f32.mxu0 %v2976_v55 }
 0x2c3   :  { %1042 = vmatmul.mubr.f32.vlgmr.msra.gmra.mrb[0].mxu1 %v835_v40 }
 0x2c4   :  { %1047 = vmatprep.mubr.f32.mxu1 %v2976_v55 }
 0x2c5   :  { %941 = vmatmul.mubr.f32.gmra.mrb[4].mxu0 %v837_v41 }
 0x2c6   :  { %946 = vmatprep.mubr.f32.mxu0 %v2976_v55 }
 0x2c7   :  { %1048 = vmatmul.mubr.f32.gmra.mrb[2].mxu1 %v836_v56 }
 0x2c8   :  { %1053 = vmatprep.mubr.f32.mxu1 %v2976_v55 }
 0x2c9   :  { %947 = vmatmul.mubr.f32.gmra.mrb[6].mxu0 %v838_v49 }
 0x2ca   :  { %952 = vmatprep.mubr.f32.mxu0 %v2976_v55 }
 0x2cb   :  { %1054 = vmatmul.mubr.f32.gmra.mrb[4].mxu1 %v837_v41 }
 0x2cc   :  { %1059 = vmatprep.mubr.f32.mxu1 %v2976_v55 }
 0x2cd   :  { %953 = vmatmul.mubr.f32.gmra.mrb[8].mxu0 %v839_v44 }
 0x2ce   :  { %958 = vmatprep.mubr.f32.mxu0 %v2976_v55 }
 0x2cf   :  { %1060 = vmatmul.mubr.f32.gmra.mrb[6].mxu1 %v838_v49 }
 0x2d0   :  { %1065 = vmatprep.mubr.f32.mxu1 %v2976_v55 }
 0x2d1   :  { %959 = vmatmul.mubr.f32.gmra.mrb[10].mxu0 %v840_v43 }
 0x2d2   :  { %964 = vmatprep.mubr.f32.mxu0 %v2976_v55 }
 0x2d3   :  { %1066 = vmatmul.mubr.f32.gmra.mrb[8].mxu1 %v839_v44 }
 0x2d4   :  { %1071 = vmatprep.mubr.f32.mxu1 %v2976_v55 }
 0x2d5   :  { %965 = vmatmul.mubr.f32.gmra.mrb[12].mxu0 %v841_v0 }
 0x2d6   :  { %970 = vmatprep.mubr.f32.mxu0 %v2976_v55 }
 0x2d7   :  { %1072 = vmatmul.mubr.f32.gmra.mrb[10].mxu1 %v840_v43 }
 0x2d8   :  { %1077 = vmatprep.mubr.f32.mxu1 %v2976_v55 }
 0x2d9   :  { %971 = vmatmul.mubr.f32.gmra.mrb[14].mxu0 %v842_v42 }
 0x2db   :  { %1078 = vmatmul.mubr.f32.gmra.mrb[12].mxu1 %v841_v0 }
 0x2dc   :  { %1083 = vmatprep.mubr.f32.mxu1 %v2976_v55  ;;  %v2695_v55 = vrot.slane %v834_v45, %v3005_v37 }
 0x2df   :  { %1084 = vmatmul.mubr.f32.gmra.mrb[14].mxu1 %v842_v42 }
 0x390   :  { %v930_v36 = vpop.f32.mrb[0].mxu0 }
 0x391   :  { %v931_v35 = vadd.f32 %v930_v36, %v2695_v55  ;;  %v932_v54 = vpop.f32.mrb[1].mxu0 }
 0x392   :  { %v933_v62 = vadd.f32 %v932_v54, %v2703_v2 }
 0x393   :  { %1090 = vst [vmem:[#allocation3] sm:$0xff] %v931_v35 }
 0x394   :  { %1091 = vst [vmem:[#allocation3 + $0x8] sm:$0xff] %v933_v62  ;;  %v936_v40 = vpop.f32.mrb[2].mxu0 }
 0x395   :  { %v937_v56 = vadd.f32 %v936_v40, %v2695_v55  ;;  %v938_v49 = vpop.f32.mrb[3].mxu0 }
 0x396   :  { %v1043_v31 = vpop.f32.mrb[0].mxu1  ;;  %v939_v43 = vadd.f32 %v938_v49, %v2703_v2 }
 0x397   :  { %v1044_v47 = vadd.f32 %v1043_v31, %v2699_v50  ;;  %v1045_v51 = vpop.f32.mrb[1].mxu1  ;;  %1094 = vst [vmem:[#allocation3 + $0x20] sm:$0xff] %v937_v56 }
 0x398   :  { %v1046_v48 = vadd.f32 %v1045_v51, %v2707_v63  ;;  %1095 = vst [vmem:[#allocation3 + $0x28] sm:$0xff] %v939_v43  ;;  %v942_v42 = vpop.f32.mrb[4].mxu0 }
 0x399   :  { %1092 = vst [vmem:[#allocation3 + $0x10] sm:$0xff] %v1044_v47  ;;  %v943_v37 = vadd.f32 %v942_v42, %v2695_v55  ;;  %v944_v39 = vpop.f32.mrb[5].mxu0 }
 0x39a   :  { %1093 = vst [vmem:[#allocation3 + $0x18] sm:$0xff] %v1046_v48  ;;  %v1049_v52 = vpop.f32.mrb[2].mxu1  ;;  %v945_v36 = vadd.f32 %v944_v39, %v2703_v2 }
 0x39b   :  { %v1050_v41 = vadd.f32 %v1049_v52, %v2699_v50  ;;  %v1051_v44 = vpop.f32.mrb[3].mxu1  ;;  %1098 = vst [vmem:[#allocation3 + $0x40] sm:$0xff] %v943_v37 }
 0x39c   :  { %v1052_v0 = vadd.f32 %v1051_v44, %v2707_v63  ;;  %1099 = vst [vmem:[#allocation3 + $0x48] sm:$0xff] %v945_v36  ;;  %v948_v35 = vpop.f32.mrb[6].mxu0 }
 0x39d   :  { %1096 = vst [vmem:[#allocation3 + $0x30] sm:$0xff] %v1050_v41  ;;  %v949_v54 = vadd.f32 %v948_v35, %v2695_v55  ;;  %v950_v62 = vpop.f32.mrb[7].mxu0 }
 0x39e   :  { %1097 = vst [vmem:[#allocation3 + $0x38] sm:$0xff] %v1052_v0  ;;  %v1055_v45 = vpop.f32.mrb[4].mxu1  ;;  %v951_v40 = vadd.f32 %v950_v62, %v2703_v2 }
 0x39f   :  { %v1056_v46 = vadd.f32 %v1055_v45, %v2699_v50  ;;  %v1057_v58 = vpop.f32.mrb[5].mxu1  ;;  %1102 = vst [vmem:[#allocation3 + $0x60] sm:$0xff] %v949_v54 }
 0x3a0   :  { %v1058_v31 = vadd.f32 %v1057_v58, %v2707_v63  ;;  %1103 = vst [vmem:[#allocation3 + $0x68] sm:$0xff] %v951_v40  ;;  %v954_v56 = vpop.f32.mrb[8].mxu0 }
 0x3a1   :  { %1100 = vst [vmem:[#allocation3 + $0x50] sm:$0xff] %v1056_v46  ;;  %v955_v49 = vadd.f32 %v954_v56, %v2695_v55  ;;  %v956_v43 = vpop.f32.mrb[9].mxu0 }
 0x3a2   :  { %1101 = vst [vmem:[#allocation3 + $0x58] sm:$0xff] %v1058_v31  ;;  %v1061_v47 = vpop.f32.mrb[6].mxu1  ;;  %v957_v42 = vadd.f32 %v956_v43, %v2703_v2 }
 0x3a3   :  { %v1062_v51 = vadd.f32 %v1061_v47, %v2699_v50  ;;  %v1063_v48 = vpop.f32.mrb[7].mxu1  ;;  %1106 = vst [vmem:[#allocation3 + $0x80] sm:$0xff] %v955_v49 }
 0x3a4   :  { %v1064_v52 = vadd.f32 %v1063_v48, %v2707_v63  ;;  %1107 = vst [vmem:[#allocation3 + $0x88] sm:$0xff] %v957_v42  ;;  %v960_v37 = vpop.f32.mrb[10].mxu0 }
 0x3a5   :  { %1104 = vst [vmem:[#allocation3 + $0x70] sm:$0xff] %v1062_v51  ;;  %v961_v39 = vadd.f32 %v960_v37, %v2695_v55  ;;  %v962_v36 = vpop.f32.mrb[11].mxu0 }
 0x3a6   :  { %1105 = vst [vmem:[#allocation3 + $0x78] sm:$0xff] %v1064_v52  ;;  %v1067_v41 = vpop.f32.mrb[8].mxu1  ;;  %v963_v35 = vadd.f32 %v962_v36, %v2703_v2 }
 0x3a7   :  { %v1068_v44 = vadd.f32 %v1067_v41, %v2699_v50  ;;  %v1069_v0 = vpop.f32.mrb[9].mxu1  ;;  %1110 = vst [vmem:[#allocation3 + $0xa0] sm:$0xff] %v961_v39 }
 0x3a8   :  { %v1070_v45 = vadd.f32 %v1069_v0, %v2707_v63  ;;  %1111 = vst [vmem:[#allocation3 + $0xa8] sm:$0xff] %v963_v35  ;;  %v966_v54 = vpop.f32.mrb[12].mxu0 }
 0x3a9   :  { %1108 = vst [vmem:[#allocation3 + $0x90] sm:$0xff] %v1068_v44  ;;  %v967_v62 = vadd.f32 %v966_v54, %v2695_v55  ;;  %v968_v40 = vpop.f32.mrb[13].mxu0 }
 0x3aa   :  { %1109 = vst [vmem:[#allocation3 + $0x98] sm:$0xff] %v1070_v45  ;;  %v1073_v46 = vpop.f32.mrb[10].mxu1  ;;  %v969_v56 = vadd.f32 %v968_v40, %v2703_v2 }
 0x3ab   :  { %v1074_v58 = vadd.f32 %v1073_v46, %v2699_v50  ;;  %v1075_v31 = vpop.f32.mrb[11].mxu1  ;;  %1114 = vst [vmem:[#allocation3 + $0xc0] sm:$0xff] %v967_v62 }
 0x3ac   :  { %v1076_v47 = vadd.f32 %v1075_v31, %v2707_v63  ;;  %1115 = vst [vmem:[#allocation3 + $0xc8] sm:$0xff] %v969_v56  ;;  %v972_v49 = vpop.f32.mrb[14].mxu0 }
 0x3ad   :  { %1112 = vst [vmem:[#allocation3 + $0xb0] sm:$0xff] %v1074_v58  ;;  %v973_v43 = vadd.f32 %v972_v49, %v2695_v55  ;;  %v974_v42 = vpop.f32.mrb[15].mxu0 }
 0x3ae   :  { %1113 = vst [vmem:[#allocation3 + $0xb8] sm:$0xff] %v1076_v47  ;;  %v1079_v51 = vpop.f32.mrb[12].mxu1  ;;  %v975_v37 = vadd.f32 %v974_v42, %v2703_v2 }
 0x3af   :  { %v1080_v48 = vadd.f32 %v1079_v51, %v2699_v50  ;;  %v1081_v52 = vpop.f32.mrb[13].mxu1  ;;  %1118 = vst [vmem:[#allocation3 + $0xe0] sm:$0xff] %v973_v43 }
 0x3b0   :  { %v1082_v41 = vadd.f32 %v1081_v52, %v2707_v63  ;;  %1119 = vst [vmem:[#allocation3 + $0xe8] sm:$0xff] %v975_v37 }
 0x3b1   :  { %1116 = vst [vmem:[#allocation3 + $0xd0] sm:$0xff] %v1080_v48 }
 0x3b2   :  { %1117 = vst [vmem:[#allocation3 + $0xd8] sm:$0xff] %v1082_v41  ;;  %v1085_v44 = vpop.f32.mrb[14].mxu1 }
 0x3b3   :  { %v1086_v0 = vadd.f32 %v1085_v44, %v2699_v50  ;;  %v1087_v45 = vpop.f32.mrb[15].mxu1 }
 0x3b4   :  { %v1088_v46 = vadd.f32 %v1087_v45, %v2707_v63 }
 0x3b5   :  { %1120 = vst [vmem:[#allocation3 + $0xf0] sm:$0xff] %v1086_v0 }
 0x3b6   :  { %1121 = vst [vmem:[#allocation3 + $0xf8] sm:$0xff] %v1088_v46 }
 0x3b7 LB: > { %v1723_v55 = vpack.c.bf16 %v2548_v4, %v2540_v59  ;;  %v1725_v50 = vpack.c.bf16 %v2546_v3, %v2536_v60  ;;  %v1727_v2 = vpack.c.bf16 %v2564_v12, %v2556_v8  ;;  %v1755_v63 = vpack.c.bf16 %v2552_v6, %v2544_v1  ;;  %v3009_v44 = vld [vmem:[#allocation14_spill] sm:$0xff]  ;;  %v3010_v43 = vld [vmem:[#allocation16_spill] sm:$0xff]  ;;  %v3011_v42 = vld [vmem:[#allocation19_spill] sm:$0xff]  ;;  %s1468_s2 = sshll.u32 %s2042_s1, 3  ;;  %s1131_s1 = sadd.s32 1, %s2042_s1   ;;  %s2042_s1 = sphi %s2747_s1, %s1131_s1   ;;  %v2038_v53 = vphi %v2683_v53, %v3038_v53   ;;  %v2034_v33 = vphi %v2688_v33, %v3037_v33  }
 0x3b8   : > { %v1757_v39 = vpack.c.bf16 %v2550_v5, %v2542_v61  ;;  %v1729_v58 = vpack.c.bf16 %v2562_v11, %v2554_v7  ;;  %v1759_v36 = vpack.c.bf16 %v2568_v14, %v2560_v10  ;;  %v1731_v31 = vpack.c.bf16 %v2580_v20, %v2572_v16  ;;  %v3012_v45 = vld [vmem:[#allocation23_spill] sm:$0xff]  ;;  %s1135_s8 = sshra.s32 %s1468_s2, 3  ;;  %s1314_s24 = scalar_lea.vmem [#allocation2], %s1468_s2 }
 0x3b9   : > { %1724 = vmatprep.subr.bf16.mxu0 %v1723_v55  ;;  %1756 = vmatprep.subr.bf16.mxu1 %v1755_v63  ;;  %v1761_v35 = vpack.c.bf16 %v2566_v13, %v2558_v9  ;;  %v1763_v47 = vpack.c.bf16 %v2584_v22, %v2576_v18  ;;  %v2052_v54 = vmov 0.0   ;;  %v1733_v51 = vpack.c.bf16 %v2578_v19, %v2570_v15  ;;  %v3013_v46 = vld [vmem:[#allocation15_spill] sm:$0xff]  ;;  %v3014_v55 = vld [vmem:[#allocation17_spill] sm:$0xff]  ;;  %s1478_s19 = sshll.u32 %s1135_s8, 5  ;;  %p1128_p5 = scmp.ge.s32.totalorder %s1131_s1, 8  }
 0x3ba   : > { %1726 = vmatpush1.bf16.msra.mxu0 %v1725_v50  ;;  %1758 = vmatpush1.bf16.msra.mxu1 %v1757_v39  ;;  %v1735_v62 = vpack.c.bf16 %v2596_v28, %v2588_v24  ;;  %v1765_v48 = vpack.c.bf16 %v2582_v21, %v2574_v17  ;;  %v1767_v40 = vpack.c.bf16 %v2600_v30, %v2592_v26  ;;  %v3016_v63 = vld [vmem:[#allocation25_spill] sm:$0xff]  ;;  %s1139_s23 = scalar_lea.vmem [#allocation3], %s1478_s19  ;;  %v2053_v60 = vmov (%p1128_p5), 0.0|0.0   ;;  %v1325_v4 = vld [vmem:[%s2907_s9 + $0x20] sm:$0xff] (%p1128_p5)  ;;  %v1326_v5 = vld [vmem:[%s2907_s9 + $0x28] sm:$0xff] (%p1128_p5) }
 0x3bb   : > { %1728 = vmatprep.subr.bf16.mxu0 %v1727_v2  ;;  %1760 = vmatprep.subr.bf16.mxu1 %v1759_v36  ;;  %v1737_v52 = vpack.c.bf16 %v2594_v27, %v2586_v23  ;;  %v1739_v56 = vpack.c.bf16 %v2612_v38, %v2604_v32  ;;  %v1769_v41 = vpack.c.bf16 %v2598_v29, %v2590_v25  ;;  %v3015_v2 = vld [vmem:[#allocation21_spill] sm:$0xff]  ;;  %v3018_v36 = vld [vmem:[#allocation22_spill] sm:$0xff]  ;;  %vm2054_vm0 = vmmov (%p1128_p5), 0   ;;  %v1327_v7 = vld [vmem:[%s2907_s9 + $0x30] sm:$0xff] (%p1128_p5) }
 0x3bc   : > { %1208 = vmatprep.mubr.f32.mxu0 %v2052_v54  ;;  %1279 = vmatprep.mubr.f32.mxu1 %v2052_v54  ;;  %v1771_v49 = vpack.c.bf16 %v2616_v57, %v2608_v34  ;;  %v1741_v0 = vpack.c.bf16 %v3010_v43, %v3009_v44  ;;  %v1743_v37 = vpack.c.bf16 %v3012_v45, %v3011_v42  ;;  %v3027_v43 = vld [vmem:[#allocation35_spill] sm:$0xff]  ;;  %v3029_v45 = vld [vmem:[#allocation28_spill] sm:$0xff]  ;;  %v1324_v61 = vld [vmem:[%s2907_s9 + $0x18] sm:$0xff] (%p1128_p5)  ;;  %v3039_v1 = vmov (%p1128_p5), 0.0  }
 0x3bd   : > { %v1773_v50 = vpack.c.bf16 %v3014_v55, %v3013_v46  ;;  %v1775_v39 = vpack.c.bf16 %v3016_v63, %v3015_v2  ;;  %v3031_v55 = vld [vmem:[#allocation37_spill] sm:$0xff]  ;;  %v3033_v63 = vld [vmem:[#allocation34_spill] sm:$0xff]  ;;  %v1794_v6 = vpack.c.bf16 (%p1128_p5), %v1326_v5, %v1325_v4  ;;  %v1330_v11 = vld [vmem:[%s2907_s9 + $0x48] sm:$0xff] (%p1128_p5) }
 0x3be   : > { %1730 = vmatpush1.bf16.msra.mxu0 %v1729_v58  ;;  %1762 = vmatpush1.bf16.msra.mxu1 %v1761_v35  ;;  %v3017_v58 = vld [vmem:[#allocation18_spill] sm:$0xff]  ;;  %v3019_v35 = vld [vmem:[#allocation27_spill] sm:$0xff]  ;;  %v1328_v8 = vld [vmem:[%s2907_s9 + $0x38] sm:$0xff] (%p1128_p5) }
 0x3bf   : > { %1732 = vmatprep.subr.bf16.mxu0 %v1731_v31  ;;  %1764 = vmatprep.subr.bf16.mxu1 %v1763_v47  ;;  %v1745_v31 = vpack.c.bf16 %v3018_v36, %v3017_v58  ;;  %v3020_v47 = vld [vmem:[#allocation31_spill] sm:$0xff]  ;;  %v3035_v36 = vld [vmem:[#allocation36_spill] sm:$0xff]  ;;  %v1797_v9 = vpack.c.bf16 (%p1128_p5), %v1328_v8, %v1327_v7  ;;  %v1329_v10 = vld [vmem:[%s2907_s9 + $0x40] sm:$0xff] (%p1128_p5) }
 0x3c0   : > { %v1747_v54 = vpack.c.bf16 %v3020_v47, %v3019_v35  ;;  %v1140_v47 = vld [vmem:[%s1139_s23] sm:$0xff]  ;;  %v1800_v12 = vpack.c.bf16 (%p1128_p5), %v1330_v11, %v1329_v10  ;;  %v1331_v13 = vld [vmem:[%s2907_s9 + $0x50] sm:$0xff] (%p1128_p5)  ;;  %v1332_v14 = vld [vmem:[%s2907_s9 + $0x58] sm:$0xff] (%p1128_p5) }
 0x3c1   :  { %v1803_v15 = vpack.c.bf16 (%p1128_p5), %v1332_v14, %v1331_v13  ;;  %v1333_v16 = vld [vmem:[%s2907_s9 + $0x60] sm:$0xff] (%p1128_p5)  ;;  %v1334_v17 = vld [vmem:[%s2907_s9 + $0x68] sm:$0xff] (%p1128_p5)  ;;  %v1335_v19 = vld [vmem:[%s2907_s9 + $0x70] sm:$0xff] (%p1128_p5) }
 0x3c2   : > { %1734 = vmatpush1.bf16.msra.mxu0 %v1733_v51  ;;  %1766 = vmatpush1.bf16.msra.mxu1 %v1765_v48  ;;  %v3021_v51 = vld [vmem:[#allocation20_spill] sm:$0xff]  ;;  %v1806_v18 = vpack.c.bf16 (%p1128_p5), %v1334_v17, %v1333_v16  ;;  %v1336_v20 = vld [vmem:[%s2907_s9 + $0x78] sm:$0xff] (%p1128_p5)  ;;  %v1476_v23 = vld [vmem:[%s2908_s10] ss:$0 sm:$0xff] (%p1128_p5) }
 0x3c3   : > { %1736 = vmatprep.subr.bf16.mxu0 %v1735_v62  ;;  %1768 = vmatprep.subr.bf16.mxu1 %v1767_v40  ;;  %v3022_v62 = vld [vmem:[#allocation24_spill] sm:$0xff]  ;;  %v3023_v40 = vld [vmem:[#allocation29_spill] sm:$0xff]  ;;  %v1809_v21 = vpack.c.bf16 (%p1128_p5), %v1336_v20, %v1335_v19 }
 0x3c4   : > { %v1777_v48 = vpack.c.bf16 %v3022_v62, %v3021_v51 }
 0x3c6   : > { %1738 = vmatpush1.bf16.msra.mxu0 %v1737_v52  ;;  %1770 = vmatpush1.bf16.msra.mxu1 %v1769_v41  ;;  %v3024_v52 = vld [vmem:[#allocation33_spill] sm:$0xff]  ;;  %v3025_v41 = vld [vmem:[#allocation26_spill] sm:$0xff] }
 0x3c7   : > { %1740 = vmatprep.subr.bf16.mxu0 %v1739_v56  ;;  %1772 = vmatprep.subr.bf16.mxu1 %v1771_v49  ;;  %v1779_v56 = vpack.c.bf16 %v3024_v52, %v3023_v40  ;;  %v3026_v49 = vld [vmem:[#allocation30_spill] sm:$0xff] }
 0x3c8   : > { %v1749_v44 = vpack.c.bf16 %v3026_v49, %v3025_v41 }
 0x3ca   : > { %1742 = vmatpush1.bf16.msra.mxu0 %v1741_v0  ;;  %1774 = vmatpush1.bf16.msra.mxu1 %v1773_v50  ;;  %v3028_v0 = vld [vmem:[#allocation39_spill] sm:$0xff]  ;;  %v3032_v50 = vld [vmem:[#allocation41_spill] sm:$0xff] }
 0x3cb   : > { %1744 = vmatprep.subr.bf16.mxu0 %v1743_v37  ;;  %1776 = vmatprep.subr.bf16.mxu1 %v1775_v39  ;;  %v1751_v42 = vpack.c.bf16 %v3028_v0, %v3027_v43  ;;  %v3030_v37 = vld [vmem:[#allocation32_spill] sm:$0xff]  ;;  %v1783_v2 = vpack.c.bf16 %v3032_v50, %v3031_v55  ;;  %v3034_v39 = vld [vmem:[#allocation38_spill] sm:$0xff] }
 0x3cc   : > { %v1781_v46 = vpack.c.bf16 %v3030_v37, %v3029_v45  ;;  %v1753_v58 = vpack.c.bf16 %v3034_v39, %v3033_v63 }
 0x3ce   : > { %1746 = vmatpush1.bf16.msra.mxu0 %v1745_v31  ;;  %1778 = vmatpush1.bf16.msra.mxu1 %v1777_v48  ;;  %v3036_v31 = vld [vmem:[#allocation40_spill] sm:$0xff] }
 0x3cf   : > { %1748 = vmatprep.subr.bf16.mxu0 %v1747_v54  ;;  %1780 = vmatprep.subr.bf16.mxu1 %v1779_v56  ;;  %v1785_v35 = vpack.c.bf16 %v3036_v31, %v3035_v36  ;;  %v1141_v54 = vld [vmem:[%s1139_s23 + $0x8] sm:$0xff] }
 0x3d2   : > { %1750 = vmatpush1.bf16.msra.mxu0 %v1749_v44  ;;  %1782 = vmatpush1.bf16.msra.mxu1 %v1781_v46  ;;  %v1143_v44 = vld [vmem:[%s1139_s23 + $0x18] sm:$0xff] }
 0x3d3   : > { %1752 = vmatprep.subr.bf16.mxu0 %v1751_v42  ;;  %1784 = vmatprep.subr.bf16.mxu1 %v1783_v2 }
 0x3d6   : > { %1754 = vmatpush1.bf16.msra.mxu0 %v1753_v58  ;;  %1786 = vmatpush1.bf16.msra.mxu1 %v1785_v35 }
 0x3d7   :  { %1787 = vmatprep.subr.bf16.mxu0 (%p1128_p5), %v2053_v60 }
 0x3d9   : > { %1209 = vmatmul.mubr.f32.vlgmr.msra.gmra.mrb[0].mxu0 %v2038_v53  ;;  %1280 = vmatmul.mubr.f32.vlgmr.msra.gmra.mrb[0].mxu1 %v2038_v53  ;;  %v1142_v53 = vld [vmem:[%s1139_s23 + $0x10] sm:$0xff] }
 0x3da   :  { %1528 = vmatprep.mubr.msk.f32.mxu0 (%p1128_p5), %vm2054_vm0, %v3039_v1 }
 0x4ac   : > { %v1210_v51 = vpop.f32.mrb[0].mxu0  ;;  %v1281_v52 = vpop.f32.mrb[0].mxu1 }
 0x4ad   : > { %v1286_v62 = vadd.f32 %v1210_v51, %v1140_v47  ;;  %v1212_v48 = vpop.f32.mrb[1].mxu0  ;;  %v1283_v41 = vpop.f32.mrb[1].mxu1  ;;  %v1288_v42 = vadd.f32 %v1281_v52, %v1142_v53 }
 0x4ae   : > { %v1287_v40 = vadd.f32 %v1212_v48, %v1141_v54  ;;  %v1289_v43 = vadd.f32 %v1283_v41, %v1143_v44  ;;  %v1322_v48 = vld [vmem:[%s2907_s9 + $0x8] sm:$0xff] (%p1128_p5) }
 0x4af   : > { %v1471_v56 = vmul.f32 -1.442695, %v1286_v62  ;;  %v1321_v62 = vld [vmem:[%s2907_s9] sm:$0xff] (%p1128_p5) }
 0x4b0   : > { %v1472_v49 = vmul.f32 -1.442695, %v1287_v40  ;;  %v1473_v0 = vmul.f32 -1.442695, %v1289_v43  ;;  %v1323_v40 = vld [vmem:[%s2907_s9 + $0x10] sm:$0xff] (%p1128_p5)  ;;  %v1788_v59 = vpack.c.bf16 (%p1128_p5), %v1322_v48, %v1321_v62 }
 0x4b1   : > { %1886 = vpow2.f32 %v1471_v56  ;;  %v1791_v3 = vpack.c.bf16 (%p1128_p5), %v1324_v61, %v1323_v40 }
 0x4b2   : > { %1888 = vpow2.f32 %v1472_v49  ;;  %1789 = vmatpush3.bf16.msra.mxu0 (%p1128_p5), %v1788_v59 }
 0x4b3   : > { %1890 = vpow2.f32 %v1473_v0  ;;  %1790 = vmatprep.subr.bf16.mxu0 (%p1128_p5), %v2053_v60 }
 0x4b4   : > { %1892 = vtanh.f32 %v1288_v42 }
 0x4b6   :  { %1792 = vmatpush3.bf16.msra.mxu0 (%p1128_p5), %v1791_v3 }
 0x4b7   :  { %1793 = vmatprep.subr.bf16.mxu0 (%p1128_p5), %v2053_v60 }
 0x4ba   :  { %1795 = vmatpush3.bf16.msra.mxu0 (%p1128_p5), %v1794_v6 }
 0x4bb   : > { %v1887_v45 = vpop.eup %1886  ;;  %1796 = vmatprep.subr.bf16.mxu0 (%p1128_p5), %v2053_v60 }
 0x4bc   : > { %v1889_v37 = vpop.eup %1888  ;;  %v1293_v46 = vadd.f32 1.0, %v1887_v45 }
 0x4bd   : > { %v1299_v55 = vadd.f32 1.0, %v1889_v37  ;;  %v1891_v50 = vpop.eup %1890 }
 0x4be   : > { %1894 = vrcp.f32 %v1293_v46  ;;  %v1893_v2 = vpop.eup %1892  ;;  %v1306_v39 = vadd.f32 1.0, %v1891_v50  ;;  %1798 = vmatpush3.bf16.msra.mxu0 (%p1128_p5), %v1797_v9 }
 0x4bf   : > { %1896 = vrcp.f32 %v1299_v55  ;;  %1799 = vmatprep.subr.bf16.mxu0 (%p1128_p5), %v2053_v60 }
 0x4c0   : > { %1898 = vrcp.f32 %v1306_v39 }
 0x4c2   :  { %1801 = vmatpush3.bf16.msra.mxu0 (%p1128_p5), %v1800_v12 }
 0x4c3   :  { %1802 = vmatprep.subr.bf16.mxu0 (%p1128_p5), %v2053_v60 }
 0x4c6   :  { %1804 = vmatpush3.bf16.msra.mxu0 (%p1128_p5), %v1803_v15 }
 0x4c7   :  { %1805 = vmatprep.subr.bf16.mxu0 (%p1128_p5), %v2053_v60 }
 0x4c8   : > { %v1895_v63 = vpop.eup %1894 }
 0x4c9   : > { %v1897_v58 = vpop.eup %1896  ;;  %v1310_v36 = vmul.f32 %v1895_v63, %v1893_v2 }
 0x4ca   : > { %v1309_v31 = vmul.f32 %v2034_v33, %v1897_v58  ;;  %v1899_v47 = vpop.eup %1898  ;;  %1807 = vmatpush3.bf16.msra.mxu0 (%p1128_p5), %v1806_v18 }
 0x4cb   :  { %1808 = vmatprep.subr.bf16.mxu0 (%p1128_p5), %v2053_v60 }
 0x4cc   : > { %v1311_v35 = vadd.f32 %v1310_v36, %v1309_v31  }
 0x4ce   : > { %1900 = vtanh.f32 %v1311_v35  ;;  %v3037_v33 = vmov %v1311_v35  ;;  %1475 = vst [vmem:[%s2911_s13 + $0x8] sm:$0xff] (%p1128_p5), %v1311_v35  ;;  %1810 = vmatpush3.bf16.msra.mxu0 (%p1128_p5), %v1809_v21 }
 0x4d5   :  { %1130 = sbr.rel (!%p1128_p5) target bundleno = 951 (0x3b7), region = 129 }
 0x4d8   : > { %v1901_v54 = vpop.eup %1900 }
 0x4d9   : > { %v1313_v51 = vmul.f32 %v1901_v54, %v1899_v47  }
 0x4db   : > { %1315 = vst [vmem:[%s1314_s24] sm:$0xff] %v1313_v51  ;;  %v3038_v53 = vmov %v1313_v51  ;;  %1474 = vst [vmem:[%s2910_s12 + $0x8] sm:$0xff] (%p1128_p5), %v1313_v51  ;;  %v1320_v22 = vmax.f32 (%p1128_p5), %v1313_v51, 0.0 }
 0x4dd   :  { %1529 = vmatmul.mubr.f32.vlgmr.msra.gmra.mrb[0].mxu0 %v1320_v22 }
 0x5b0   :  { %v1410_v24 = vpop.f32.mrb[0].mxu0 }
 0x5b1   :  { %v1411_v25 = vadd.f32 %v1476_v23, %v1410_v24  ;;  %v1530_v26 = vpop.f32.mrb[1].mxu0 }
 0x5b3   :  { %1414 = vst [vmem:[%s2909_s11] sm:$0xff] %v1411_v25 }
 0x5b4   :  { %1427 = vsyncpa [#allocation5], 1 }
 0x5b5   :  { %1428 = vsyncpa [#allocation7], 1 }
 0x5b6   :  { %1429 = vsyncpa [#allocation10], 1 }

</bundles_post_ra>
